<compile_context>
chip_gen: v6e
topology: v6e:2x2x1
jax: 0.10.0
libtpu: 0.0.40
codegen_flags: <defaults>
</compile_context>

<pallas_src>
import functools

import jax
import jax.numpy as jnp
from jax.experimental import pallas as pl
from jax.experimental.pallas import tpu as pltpu

_MIB = 1024 * 1024


def _aspp_kernel(x_ref, w_ref, bias_ref, o_ref, *, H, W, KH, KW, dilation):
    """Grid = (N, Cout tiles, Cin tiles); axis 2 (Cin) is the reduction axis.

    x_ref:    (1, Hp, Wp, tk)   padded NHWC input, one Cin tile (VMEM)
    w_ref:    (KH*KW, tk, tn)   BN-scale-folded conv weight, tap-major (VMEM)
    bias_ref: (1, tn)           folded BN bias (f32)
    o_ref:    (1, H, W, tn)     f32 output tile; resident across the Cin axis
                                and used directly as the accumulator.
    """
    k = pl.program_id(2)
    nk = pl.num_programs(2)

    # Dilated conv: KH*KW shifted-window MXU matmuls chained into ONE local f32
    # accumulator.  Only KW unaligned W (sublane-axis) slices per grid step;
    # the per-kh H slice is along a major axis and costs no relayout.
    acc = None
    for kw in range(KW):
        xw = x_ref[0, :, kw * dilation: kw * dilation + W, :]
        for kh in range(KH):
            xs = xw[kh * dilation: kh * dilation + H, :, :]
            part = jax.lax.dot_general(
                xs, w_ref[kh * KW + kw],
                dimension_numbers=(((2,), (0,)), ((), ())),
                preferred_element_type=jnp.float32)
            acc = part if acc is None else acc + part

    # The resident output block is the accumulator: one read + one write per
    # Cin step (plus a zero-init store only at k == 0).
    @pl.when(k == 0)
    def _():
        o_ref[0] = jnp.zeros(o_ref.shape[1:], o_ref.dtype)

    y = o_ref[0] + acc

    @pl.when(k < nk - 1)
    def _():
        o_ref[0] = y

    # Epilogue (folded-BN bias + ReLU) fused into the last Cin step.
    @pl.when(k == nk - 1)
    def _():
        o_ref[0] = jnp.maximum(y + bias_ref[0, :], 0.0)


def _round_up(x, m):
    return (x + m - 1) // m * m


def _vmem_capacity_bytes():
    try:
        return int(pltpu.get_tpu_info().vmem_capacity_bytes)
    except Exception:
        return 64 * _MIB  # conservative fallback (v7x per-TC VMEM)


def _is_v5e():
    try:
        kind = jax.devices()[0].device_kind.lower()
    except Exception:
        return False
    return ("v5 lite" in kind) or ("v5e" in kind) or ("v5litepod" in kind)


def _pick_tiles(Cin, Cout_p, Hp, Wp, H, W, KH, KW, item_bytes):
    """Generation-aware (tk, tn, vmem_limit_bytes) selection."""
    vmem_cap = _vmem_capacity_bytes()
    vmem_limit = max(32 * _MIB, min(vmem_cap - 16 * _MIB, 96 * _MIB))
    budget = vmem_limit - 8 * _MIB  # headroom under the scoped limit

    # v5e MXU is 4x128x128 -> tn=128 loses nothing and shrinks the f32 acc rows.
    tn = 256 if (not _is_v5e() and Cout_p % 256 == 0) else 128

    cand = [t for t in (512, 256, 128) if Cin % t == 0]
    if vmem_cap <= 80 * _MIB:          # v7x (64 MiB physical): cap tk at 256
        cand = [t for t in cand if t <= 256]
    if not cand:
        cand = [Cin]                   # small / irregular channel count
    tk = cand[-1]
    for t in cand:                     # largest Cin tile whose working set fits
        wset = (2 * Hp * Wp * t * item_bytes          # double-buffered input
                + 2 * KH * KW * t * tn * item_bytes   # double-buffered weights
                + 2 * H * W * tn * 4)                 # f32 output block
        if wset <= budget:
            tk = t
            break
    return tk, tn, int(vmem_limit)


@functools.partial(
    jax.jit, static_argnames=("padding", "dilation", "eps", "compute_dtype"))
def aspp_module_forward(x_nchw, weight_oihw, bn_gamma, bn_beta, bn_mean, bn_var,
                        *, padding, dilation, eps=1e-5,
                        compute_dtype=jnp.bfloat16):
    """Forward of _ASPPModule.  x_nchw: [N, Cin, H, W] f32 -> [N, Cout, H', W']."""
    N, Cin, H, W = x_nchw.shape
    Cout, _, KH, KW = weight_oihw.shape

    # PyTorch Conv2d (stride=1) output size; equals (H, W) for ASPP's
    # padding == dilation * (KH - 1) / 2 convention.
    H_out = H + 2 * padding - dilation * (KH - 1)
    W_out = W + 2 * padding - dilation * (KW - 1)
    assert H_out >= 1 and W_out >= 1, (H_out, W_out)

    # ---- glue (one fused XLA pass): NCHW->NHWC, zero pad, cast ----
    x_pad = jnp.pad(jnp.transpose(x_nchw, (0, 2, 3, 1)),
                    ((0, 0), (padding, padding), (padding, padding), (0, 0)))
    x_pad = x_pad.astype(compute_dtype)
    Hp, Wp = x_pad.shape[1], x_pad.shape[2]

    # Channel tiling; Cout padded to a lane-dense multiple of 128.
    Cout_p = _round_up(Cout, 128)
    item = jnp.dtype(compute_dtype).itemsize
    tk, tn, vmem_limit = _pick_tiles(Cin, Cout_p, Hp, Wp, H_out, W_out,
                                     KH, KW, item)

    # Fold eval-mode BatchNorm: scale into the conv weights, bias kept for the
    # epilogue.  (Matches _init_weight(): gamma=1, beta=0, mean=0, var=1.)
    inv_std = 1.0 / jnp.sqrt(bn_var.astype(jnp.float32) + eps)
    scale = bn_gamma.astype(jnp.float32) * inv_std                       # [Cout]
    bias = bn_beta.astype(jnp.float32) - bn_mean.astype(jnp.float32) * scale
    bias = jnp.pad(bias, (0, Cout_p - Cout)).reshape(1, Cout_p)

    # [Cout, Cin, KH, KW] -> [KH*KW, Cin, Cout_p], tap-major, scale folded in.
    w_scaled = weight_oihw.astype(jnp.float32) * scale[:, None, None, None]
    w_taps = jnp.transpose(w_scaled, (2, 3, 1, 0)).reshape(KH * KW, Cin, Cout)
    w_taps = jnp.pad(w_taps, ((0, 0), (0, 0), (0, Cout_p - Cout)))
    w_taps = w_taps.astype(compute_dtype)

    kernel = functools.partial(_aspp_kernel, H=H_out, W=W_out,
                               KH=KH, KW=KW, dilation=dilation)

    flops = 2 * N * H_out * W_out * Cin * Cout_p * KH * KW
    bytes_accessed = (N * Hp * Wp * Cin * item
                      + KH * KW * Cin * Cout_p * item
                      + N * H_out * W_out * Cout_p * 4)

    out_nhwc = pl.pallas_call(
        kernel,
        out_shape=jax.ShapeDtypeStruct((N, H_out, W_out, Cout_p), jnp.float32),
        grid_spec=pltpu.PrefetchScalarGridSpec(
            num_scalar_prefetch=0,
            grid=(N, Cout_p // tn, Cin // tk),
            in_specs=[
                pl.BlockSpec((1, Hp, Wp, tk), lambda n, j, k: (n, 0, 0, k)),
                pl.BlockSpec((KH * KW, tk, tn), lambda n, j, k: (0, k, j)),
                pl.BlockSpec((1, tn), lambda n, j, k: (0, j)),
            ],
            out_specs=pl.BlockSpec((1, H_out, W_out, tn),
                                   lambda n, j, k: (n, 0, 0, j)),
        ),
        compiler_params=pltpu.CompilerParams(
            dimension_semantics=("parallel", "parallel", "arbitrary"),
            vmem_limit_bytes=vmem_limit,
        ),
        cost_estimate=pl.CostEstimate(
            flops=int(flops), transcendentals=0,
            bytes_accessed=int(bytes_accessed)),
    )(x_pad, w_taps, bias)

    # Drop Cout padding, back to NCHW to match PyTorch.
    return jnp.transpose(out_nhwc[..., :Cout], (0, 3, 1, 2))


def _reference_forward(x_nchw, weight_oihw, bn_gamma, bn_beta, bn_mean, bn_var,
                       *, padding, dilation, eps=1e-5):
    """Pure-JAX reference (lax conv, f32) for correctness checking."""
    y = jax.lax.conv_general_dilated(
        x_nchw, weight_oihw,
        window_strides=(1, 1),
        padding=[(padding, padding), (padding, padding)],
        rhs_dilation=(dilation, dilation),
        dimension_numbers=("NCHW", "OIHW", "NCHW"),
        precision=jax.lax.Precision.HIGHEST)
    inv_std = 1.0 / jnp.sqrt(bn_var + eps)
    scale = (bn_gamma * inv_std).reshape(1, -1, 1, 1)
    bias = (bn_beta - bn_mean * bn_gamma * inv_std).reshape(1, -1, 1, 1)
    return jnp.maximum(y * scale + bias, 0.0)


if __name__ == "__main__":
    # Small shapes consistent with an ASPP branch:
    #   inplanes=4, planes=8, kernel_size=3, padding=6, dilation=6
    N, Cin, H, W = 2, 4, 16, 16
    Cout, KH, KW = 8, 3, 3
    padding, dilation = 6, 6

    key = jax.random.PRNGKey(0)
    kx, kw = jax.random.split(key)

    x = jax.random.normal(kx, (N, Cin, H, W), dtype=jnp.float32)

    # Conv weight: kaiming_normal_ (fan_in, gain=sqrt(2)), no bias.
    fan_in = Cin * KH * KW
    std = (2.0 / fan_in) ** 0.5
    weight = jax.random.normal(kw, (Cout, Cin, KH, KW), dtype=jnp.float32) * std

    # BatchNorm params exactly as _init_weight(): weight=1, bias=0;
    # fresh running stats: mean=0, var=1 (eval-mode BN semantics).
    bn_gamma = jnp.ones((Cout,), jnp.float32)
    bn_beta = jnp.zeros((Cout,), jnp.float32)
    bn_mean = jnp.zeros((Cout,), jnp.float32)
    bn_var = jnp.ones((Cout,), jnp.float32)

    ref = _reference_forward(x, weight, bn_gamma, bn_beta, bn_mean, bn_var,
                             padding=padding, dilation=dilation)

    # 1) structural check with f32 MXU operands (near-exact; MXU default
    #    precision, not bit-exact vs Precision.HIGHEST).
    out_f32 = aspp_module_forward(x, weight, bn_gamma, bn_beta, bn_mean, bn_var,
                                  padding=padding, dilation=dilation,
                                  compute_dtype=jnp.float32)
    out_f32 = jax.block_until_ready(out_f32)
    assert out_f32.shape == (N, Cout, H, W), out_f32.shape
    assert jnp.allclose(out_f32, ref, atol=2e-3, rtol=2e-3), \
        float(jnp.max(jnp.abs(out_f32 - ref)))

    # 2) fast path (default): bf16 MXU operands, f32 accumulation.
    #    Precision contract: inference-grade (bf16 inputs/weights) vs PyTorch f32.
    out = aspp_module_forward(x, weight, bn_gamma, bn_beta, bn_mean, bn_var,
                              padding=padding, dilation=dilation)
    out = jax.block_until_ready(out)
    assert out.shape == (N, Cout, H, W), out.shape
    assert jnp.allclose(out, ref, atol=1e-1, rtol=1e-1), \
        float(jnp.max(jnp.abs(out - ref)))

    print("KERNEL_OK")
</pallas_src>

<mosaic_0001>
module attributes {stable_mosaic.version = 11 : i64} {
  func.func @_aspp_kernel(%arg0: i32, %arg1: i32, %arg2: i32, %arg3: memref<1x28x28x4xf32, #tpu.memory_space<vmem>>, %arg4: memref<9x4x128xf32, #tpu.memory_space<vmem>>, %arg5: memref<1x128xf32, #tpu.memory_space<vmem>>, %arg6: memref<1x16x16x128xf32, #tpu.memory_space<vmem>>) attributes {dimension_semantics = [#tpu.dimension_semantics<parallel>, #tpu.dimension_semantics<parallel>, #tpu.dimension_semantics<arbitrary>], iteration_bounds = array<i64: 2, 1, 1>, scalar_prefetch = 0 : i64, scratch_operands = 0 : i64, tpu.core_type = #tpu.core_type<tc>, window_params = [{transform_indices = @transform_0, window_bounds = array<i64: 1, 28, 28, 4>}, {transform_indices = @transform_1, window_bounds = array<i64: 9, 4, 128>}, {transform_indices = @transform_2, window_bounds = array<i64: 1, 128>}, {transform_indices = @transform_3, window_bounds = array<i64: 1, 16, 16, 128>}]} {
    %c0 = arith.constant 0 : index
    %c0_0 = arith.constant 0 : index
    %c0_1 = arith.constant 0 : index
    %c0_2 = arith.constant 0 : index
    %0 = vector.load %arg3[%c0, %c0_0, %c0_1, %c0_2] : memref<1x28x28x4xf32, #tpu.memory_space<vmem>>, vector<1x28x16x4xf32>
    %1 = vector.shape_cast %0 : vector<1x28x16x4xf32> to vector<28x16x4xf32>
    %2 = vector.extract_strided_slice %1 {offsets = [0, 0, 0], sizes = [16, 16, 4], strides = [1, 1, 1]} : vector<28x16x4xf32> to vector<16x16x4xf32>
    %c0_3 = arith.constant 0 : index
    %c0_4 = arith.constant 0 : index
    %c0_5 = arith.constant 0 : index
    %3 = vector.load %arg4[%c0_3, %c0_4, %c0_5] : memref<9x4x128xf32, #tpu.memory_space<vmem>>, vector<1x4x128xf32>
    %4 = vector.shape_cast %3 : vector<1x4x128xf32> to vector<4x128xf32>
    %cst = arith.constant dense<0.000000e+00> : vector<16x16x128xf32>
    %5 = tpu.matmul %2, %4, %cst {dimension_numbers = #tpu.dot_dimension_numbers<[2], [0], [0, 1], [1], [0, 0, 0, 1, 1, 1], [], []>} : vector<16x16x4xf32>, vector<4x128xf32>, vector<16x16x128xf32> -> vector<16x16x128xf32>
    %6 = vector.extract_strided_slice %1 {offsets = [6, 0, 0], sizes = [16, 16, 4], strides = [1, 1, 1]} : vector<28x16x4xf32> to vector<16x16x4xf32>
    %c3 = arith.constant 3 : index
    %c0_6 = arith.constant 0 : index
    %c0_7 = arith.constant 0 : index
    %7 = vector.load %arg4[%c3, %c0_6, %c0_7] : memref<9x4x128xf32, #tpu.memory_space<vmem>>, vector<1x4x128xf32>
    %8 = vector.shape_cast %7 : vector<1x4x128xf32> to vector<4x128xf32>
    %cst_8 = arith.constant dense<0.000000e+00> : vector<16x16x128xf32>
    %9 = tpu.matmul %6, %8, %cst_8 {dimension_numbers = #tpu.dot_dimension_numbers<[2], [0], [0, 1], [1], [0, 0, 0, 1, 1, 1], [], []>} : vector<16x16x4xf32>, vector<4x128xf32>, vector<16x16x128xf32> -> vector<16x16x128xf32>
    %10 = arith.addf %5, %9 : vector<16x16x128xf32>
    %11 = vector.extract_strided_slice %1 {offsets = [12, 0, 0], sizes = [16, 16, 4], strides = [1, 1, 1]} : vector<28x16x4xf32> to vector<16x16x4xf32>
    %c6 = arith.constant 6 : index
    %c0_9 = arith.constant 0 : index
    %c0_10 = arith.constant 0 : index
    %12 = vector.load %arg4[%c6, %c0_9, %c0_10] : memref<9x4x128xf32, #tpu.memory_space<vmem>>, vector<1x4x128xf32>
    %13 = vector.shape_cast %12 : vector<1x4x128xf32> to vector<4x128xf32>
    %cst_11 = arith.constant dense<0.000000e+00> : vector<16x16x128xf32>
    %14 = tpu.matmul %11, %13, %cst_11 {dimension_numbers = #tpu.dot_dimension_numbers<[2], [0], [0, 1], [1], [0, 0, 0, 1, 1, 1], [], []>} : vector<16x16x4xf32>, vector<4x128xf32>, vector<16x16x128xf32> -> vector<16x16x128xf32>
    %15 = arith.addf %10, %14 : vector<16x16x128xf32>
    %c0_12 = arith.constant 0 : index
    %c0_13 = arith.constant 0 : index
    %c6_14 = arith.constant 6 : index
    %c0_15 = arith.constant 0 : index
    %16 = vector.load %arg3[%c0_12, %c0_13, %c6_14, %c0_15] : memref<1x28x28x4xf32, #tpu.memory_space<vmem>>, vector<1x28x16x4xf32>
    %17 = vector.shape_cast %16 : vector<1x28x16x4xf32> to vector<28x16x4xf32>
    %18 = vector.extract_strided_slice %17 {offsets = [0, 0, 0], sizes = [16, 16, 4], strides = [1, 1, 1]} : vector<28x16x4xf32> to vector<16x16x4xf32>
    %c1 = arith.constant 1 : index
    %c0_16 = arith.constant 0 : index
    %c0_17 = arith.constant 0 : index
    %19 = vector.load %arg4[%c1, %c0_16, %c0_17] : memref<9x4x128xf32, #tpu.memory_space<vmem>>, vector<1x4x128xf32>
    %20 = vector.shape_cast %19 : vector<1x4x128xf32> to vector<4x128xf32>
    %cst_18 = arith.constant dense<0.000000e+00> : vector<16x16x128xf32>
    %21 = tpu.matmul %18, %20, %cst_18 {dimension_numbers = #tpu.dot_dimension_numbers<[2], [0], [0, 1], [1], [0, 0, 0, 1, 1, 1], [], []>} : vector<16x16x4xf32>, vector<4x128xf32>, vector<16x16x128xf32> -> vector<16x16x128xf32>
    %22 = arith.addf %15, %21 : vector<16x16x128xf32>
    %23 = vector.extract_strided_slice %17 {offsets = [6, 0, 0], sizes = [16, 16, 4], strides = [1, 1, 1]} : vector<28x16x4xf32> to vector<16x16x4xf32>
    %c4 = arith.constant 4 : index
    %c0_19 = arith.constant 0 : index
    %c0_20 = arith.constant 0 : index
    %24 = vector.load %arg4[%c4, %c0_19, %c0_20] : memref<9x4x128xf32, #tpu.memory_space<vmem>>, vector<1x4x128xf32>
    %25 = vector.shape_cast %24 : vector<1x4x128xf32> to vector<4x128xf32>
    %cst_21 = arith.constant dense<0.000000e+00> : vector<16x16x128xf32>
    %26 = tpu.matmul %23, %25, %cst_21 {dimension_numbers = #tpu.dot_dimension_numbers<[2], [0], [0, 1], [1], [0, 0, 0, 1, 1, 1], [], []>} : vector<16x16x4xf32>, vector<4x128xf32>, vector<16x16x128xf32> -> vector<16x16x128xf32>
    %27 = arith.addf %22, %26 : vector<16x16x128xf32>
    %28 = vector.extract_strided_slice %17 {offsets = [12, 0, 0], sizes = [16, 16, 4], strides = [1, 1, 1]} : vector<28x16x4xf32> to vector<16x16x4xf32>
    %c7 = arith.constant 7 : index
    %c0_22 = arith.constant 0 : index
    %c0_23 = arith.constant 0 : index
    %29 = vector.load %arg4[%c7, %c0_22, %c0_23] : memref<9x4x128xf32, #tpu.memory_space<vmem>>, vector<1x4x128xf32>
    %30 = vector.shape_cast %29 : vector<1x4x128xf32> to vector<4x128xf32>
    %cst_24 = arith.constant dense<0.000000e+00> : vector<16x16x128xf32>
    %31 = tpu.matmul %28, %30, %cst_24 {dimension_numbers = #tpu.dot_dimension_numbers<[2], [0], [0, 1], [1], [0, 0, 0, 1, 1, 1], [], []>} : vector<16x16x4xf32>, vector<4x128xf32>, vector<16x16x128xf32> -> vector<16x16x128xf32>
    %32 = arith.addf %27, %31 : vector<16x16x128xf32>
    %c0_25 = arith.constant 0 : index
    %c0_26 = arith.constant 0 : index
    %c12 = arith.constant 12 : index
    %c0_27 = arith.constant 0 : index
    %33 = vector.load %arg3[%c0_25, %c0_26, %c12, %c0_27] : memref<1x28x28x4xf32, #tpu.memory_space<vmem>>, vector<1x28x16x4xf32>
    %34 = vector.shape_cast %33 : vector<1x28x16x4xf32> to vector<28x16x4xf32>
    %35 = vector.extract_strided_slice %34 {offsets = [0, 0, 0], sizes = [16, 16, 4], strides = [1, 1, 1]} : vector<28x16x4xf32> to vector<16x16x4xf32>
    %c2 = arith.constant 2 : index
    %c0_28 = arith.constant 0 : index
    %c0_29 = arith.constant 0 : index
    %36 = vector.load %arg4[%c2, %c0_28, %c0_29] : memref<9x4x128xf32, #tpu.memory_space<vmem>>, vector<1x4x128xf32>
    %37 = vector.shape_cast %36 : vector<1x4x128xf32> to vector<4x128xf32>
    %cst_30 = arith.constant dense<0.000000e+00> : vector<16x16x128xf32>
    %38 = tpu.matmul %35, %37, %cst_30 {dimension_numbers = #tpu.dot_dimension_numbers<[2], [0], [0, 1], [1], [0, 0, 0, 1, 1, 1], [], []>} : vector<16x16x4xf32>, vector<4x128xf32>, vector<16x16x128xf32> -> vector<16x16x128xf32>
    %39 = arith.addf %32, %38 : vector<16x16x128xf32>
    %40 = vector.extract_strided_slice %34 {offsets = [6, 0, 0], sizes = [16, 16, 4], strides = [1, 1, 1]} : vector<28x16x4xf32> to vector<16x16x4xf32>
    %c5 = arith.constant 5 : index
    %c0_31 = arith.constant 0 : index
    %c0_32 = arith.constant 0 : index
    %41 = vector.load %arg4[%c5, %c0_31, %c0_32] : memref<9x4x128xf32, #tpu.memory_space<vmem>>, vector<1x4x128xf32>
    %42 = vector.shape_cast %41 : vector<1x4x128xf32> to vector<4x128xf32>
    %cst_33 = arith.constant dense<0.000000e+00> : vector<16x16x128xf32>
    %43 = tpu.matmul %40, %42, %cst_33 {dimension_numbers = #tpu.dot_dimension_numbers<[2], [0], [0, 1], [1], [0, 0, 0, 1, 1, 1], [], []>} : vector<16x16x4xf32>, vector<4x128xf32>, vector<16x16x128xf32> -> vector<16x16x128xf32>
    %44 = arith.addf %39, %43 : vector<16x16x128xf32>
    %45 = vector.extract_strided_slice %34 {offsets = [12, 0, 0], sizes = [16, 16, 4], strides = [1, 1, 1]} : vector<28x16x4xf32> to vector<16x16x4xf32>
    %c8 = arith.constant 8 : index
    %c0_34 = arith.constant 0 : index
    %c0_35 = arith.constant 0 : index
    %46 = vector.load %arg4[%c8, %c0_34, %c0_35] : memref<9x4x128xf32, #tpu.memory_space<vmem>>, vector<1x4x128xf32>
    %47 = vector.shape_cast %46 : vector<1x4x128xf32> to vector<4x128xf32>
    %cst_36 = arith.constant dense<0.000000e+00> : vector<16x16x128xf32>
    %48 = tpu.matmul %45, %47, %cst_36 {dimension_numbers = #tpu.dot_dimension_numbers<[2], [0], [0, 1], [1], [0, 0, 0, 1, 1, 1], [], []>} : vector<16x16x4xf32>, vector<4x128xf32>, vector<16x16x128xf32> -> vector<16x16x128xf32>
    %49 = arith.addf %44, %48 : vector<16x16x128xf32>
    %c0_i32 = arith.constant 0 : i32
    %50 = arith.cmpi eq, %arg2, %c0_i32 : i32
    %51 = arith.extui %50 : i1 to i32
    %c0_i32_37 = arith.constant 0 : i32
    %52 = arith.cmpi ne, %51, %c0_i32_37 : i32
    scf.if %52 {
      %cst_46 = arith.constant 0.000000e+00 : f32
      %62 = vector.broadcast %cst_46 : f32 to vector<16x16x128xf32>
      %c0_47 = arith.constant 0 : index
      %c0_48 = arith.constant 0 : index
      %c0_49 = arith.constant 0 : index
      %c0_50 = arith.constant 0 : index
      %63 = vector.load %arg6[%c0_47, %c0_48, %c0_49, %c0_50] : memref<1x16x16x128xf32, #tpu.memory_space<vmem>>, vector<1x16x16x128xf32>
      %64 = vector.shape_cast %63 : vector<1x16x16x128xf32> to vector<16x16x128xf32>
      %65 = vector.shape_cast %62 : vector<16x16x128xf32> to vector<1x16x16x128xf32>
      tpu.vector_store %arg6[%c0_47, %c0_48, %c0_49, %c0_50], %65 {strides = array<i32>} : memref<1x16x16x128xf32, #tpu.memory_space<vmem>>, vector<1x16x16x128xf32>,
    } else {
    }
    %c0_38 = arith.constant 0 : index
    %c0_39 = arith.constant 0 : index
    %c0_40 = arith.constant 0 : index
    %c0_41 = arith.constant 0 : index
    %53 = vector.load %arg6[%c0_38, %c0_39, %c0_40, %c0_41] : memref<1x16x16x128xf32, #tpu.memory_space<vmem>>, vector<1x16x16x128xf32>
    %54 = vector.shape_cast %53 : vector<1x16x16x128xf32> to vector<16x16x128xf32>
    %55 = arith.addf %54, %49 : vector<16x16x128xf32>
    %c0_i32_42 = arith.constant 0 : i32
    %56 = arith.cmpi slt, %arg2, %c0_i32_42 : i32
    %57 = arith.extui %56 : i1 to i32
    %c0_i32_43 = arith.constant 0 : i32
    %58 = arith.cmpi ne, %57, %c0_i32_43 : i32
    scf.if %58 {
      %c0_46 = arith.constant 0 : index
      %c0_47 = arith.constant 0 : index
      %c0_48 = arith.constant 0 : index
      %c0_49 = arith.constant 0 : index
      %62 = vector.load %arg6[%c0_46, %c0_47, %c0_48, %c0_49] : memref<1x16x16x128xf32, #tpu.memory_space<vmem>>, vector<1x16x16x128xf32>
      %63 = vector.shape_cast %62 : vector<1x16x16x128xf32> to vector<16x16x128xf32>
      %64 = vector.shape_cast %55 : vector<16x16x128xf32> to vector<1x16x16x128xf32>
      tpu.vector_store %arg6[%c0_46, %c0_47, %c0_48, %c0_49], %64 {strides = array<i32>} : memref<1x16x16x128xf32, #tpu.memory_space<vmem>>, vector<1x16x16x128xf32>,
    } else {
    }
    %c0_i32_44 = arith.constant 0 : i32
    %59 = arith.cmpi eq, %arg2, %c0_i32_44 : i32
    %60 = arith.extui %59 : i1 to i32
    %c0_i32_45 = arith.constant 0 : i32
    %61 = arith.cmpi ne, %60, %c0_i32_45 : i32
    scf.if %61 {
      %c0_46 = arith.constant 0 : index
      %c0_47 = arith.constant 0 : index
      %62 = vector.load %arg5[%c0_46, %c0_47] : memref<1x128xf32, #tpu.memory_space<vmem>>, vector<1x128xf32>
      %63 = vector.shape_cast %62 : vector<1x128xf32> to vector<128xf32>
      %64 = vector.shape_cast %63 : vector<128xf32> to vector<1x1x128xf32>
      %65 = vector.broadcast %64 : vector<1x1x128xf32> to vector<16x16x128xf32>
      %66 = arith.addf %55, %65 : vector<16x16x128xf32>
      %cst_48 = arith.constant 0.000000e+00 : f32
      %67 = vector.broadcast %cst_48 : f32 to vector<16x16x128xf32>
      %68 = arith.maximumf %66, %67 : vector<16x16x128xf32>
      %c0_49 = arith.constant 0 : index
      %c0_50 = arith.constant 0 : index
      %c0_51 = arith.constant 0 : index
      %c0_52 = arith.constant 0 : index
      %69 = vector.load %arg6[%c0_49, %c0_50, %c0_51, %c0_52] : memref<1x16x16x128xf32, #tpu.memory_space<vmem>>, vector<1x16x16x128xf32>
      %70 = vector.shape_cast %69 : vector<1x16x16x128xf32> to vector<16x16x128xf32>
      %71 = vector.shape_cast %68 : vector<16x16x128xf32> to vector<1x16x16x128xf32>
      tpu.vector_store %arg6[%c0_49, %c0_50, %c0_51, %c0_52], %71 {strides = array<i32>} : memref<1x16x16x128xf32, #tpu.memory_space<vmem>>, vector<1x16x16x128xf32>,
    } else {
    }
    return
  }
  func.func @transform_0(%arg0: i32, %arg1: i32, %arg2: i32) -> (i32, i32, i32, i32) {
    %c0_i32 = arith.constant 0 : i32
    %c0_i32_0 = arith.constant 0 : i32
    %c0_i32_1 = arith.constant 0 : i32
    return %arg0, %c0_i32, %c0_i32_0, %arg2 : i32, i32, i32, i32
  }
  func.func @transform_1(%arg0: i32, %arg1: i32, %arg2: i32) -> (i32, i32, i32) {
    %c0_i32 = arith.constant 0 : i32
    %c0_i32_0 = arith.constant 0 : i32
    return %c0_i32, %arg2, %arg1 : i32, i32, i32
  }
  func.func @transform_2(%arg0: i32, %arg1: i32, %arg2: i32) -> (i32, i32) {
    %c0_i32 = arith.constant 0 : i32
    %c0_i32_0 = arith.constant 0 : i32
    return %c0_i32, %arg1 : i32, i32
  }
  func.func @transform_3(%arg0: i32, %arg1: i32, %arg2: i32) -> (i32, i32, i32, i32) {
    %c0_i32 = arith.constant 0 : i32
    %c0_i32_0 = arith.constant 0 : i32
    %c0_i32_1 = arith.constant 0 : i32
    return %arg0, %c0_i32, %c0_i32_0, %arg1 : i32, i32, i32, i32
  }
}

</mosaic_0001>

<bundles_post_ra>
// kernel: aspp_module_forward.1
= control target key start
LH: loop header
LB: loop body
LE: loop exit
PB: predicated region body
PF: predicated region fallthrough
CT: control target
= control target key end

     0   :  { %s4715_s12 = smov 0   ;;  %s4717_s13 = smov 0   ;;  %s6177_s0 = inlined_call_operand.vmem [shape: f32[2,28,28,4], index: 0, kind: input, shape index: {}]   ;;  %s6178_s1 = inlined_call_operand.vmem [shape: f32[9,4,128], index: 1, kind: input, shape index: {}]   ;;  %s6179_s2 = inlined_call_operand.vmem [shape: f32[1,128], index: 2, kind: input, shape index: {}]   ;;  %s6180_s3 = inlined_call_operand.vmem [shape: f32[2,16,16,128], index: 3, kind: output, shape index: {}]  }
   0x1   :  { %s4719_s14 = smov 0  }
   0x2 LB: > { %s32_s15 = sadd.s32 1, %s4689_s13  ;;  %p3583_p0 = scmp.ge.s32.totalorder %s4693_s14, 1  ;;  %s4693_s14 = sphi %s4719_s14, %s13_s14   ;;  %s4689_s13 = sphi %s4717_s13, %s6266_s13   ;;  %s4685_s12 = sphi %s4715_s12, %s6265_s12  }
   0x3   : > { %p34_p1 = scmp.ge.s32.totalorder %s32_s15, 2  ;;  %p185_p2 = scmp.lt.s32.totalorder %s4693_s14, 3 }
   0x5   : > { %s6268_s15 = smov (%p34_p1, %s32_s15), 0  ;;  %p186_p3 = pnand %p3583_p0, %p185_p2 }
   0x7   : > { %189 = sbr.rel (%p186_p3) target bundleno = 509 (0x1fd), region = 32 }
   0xc   : > { %v3587_v0 = vld [vmem:[%s6178_s1 + $0xc] sm:$0xf]  ;;  %vm407_vm0 = vcmask 1043456   ;;  %p225_p4 = scmp.lt.s32.totalorder %s4685_s12, 1  ;;  %v307_v1 = vld [vmem:[%s6178_s1] sm:$0xf] }
   0xd   : > { %4643 = vmatprep.subr.msk.mxu1 %vm407_vm0, %v3587_v0  ;;  %4193 = vmatprep.subr.msk.mxu0 %vm407_vm0, %v3587_v0  ;;  %v3654_v2 = vld [vmem:[%s6178_s1 + $0x18] sm:$0xf]  ;;  %vm310_vm1 = vcmask 31744   ;;  %v4785_v9 = vld [vmem:[%s6178_s1 + $0x4] sm:$0xf] }
   0xe   : > { %4644 = vmatpush3.msk.msra.mxu1 %vm407_vm0, %v3587_v0  ;;  %4194 = vmatpush3.msk.msra.mxu0 %vm407_vm0, %v3587_v0  ;;  %s6270_s12 = smov (!%p225_p4, %s4685_s12), 1  ;;  %v4790_v10 = vld [vmem:[%s6178_s1 + $0x10] sm:$0xf]  ;;  %v4941_v40 = vld [vmem:[%s6178_s1 + $0x1c] sm:$0xf] }
   0xf   : > { %4243 = vmatprep.subr.msk.mxu1 %vm407_vm0, %v307_v1  ;;  %4293 = vmatprep.subr.msk.mxu0 %vm407_vm0, %v3654_v2  ;;  %s4645_s22 = smul.u32 896, %s6270_s12  ;;  %v4946_v41 = vld [vmem:[%s6178_s1 + $0x8] sm:$0xf]  ;;  %s3895_s17 = sshll.u32 %s6270_s12, 8 }
  0x10   : > { %s6029_s19 = scalar_lea.vmem %s6180_s3, %s3895_s17 }
  0x11   : > { %s4754_s25 = scalar_lea.vmem %s6177_s0, %s4645_s22 }
  0x12   : > { %v4757_v3 = vld [vmem:[%s4754_s25 + $0xc0] sm:$0xff]  ;;  %v4763_v5 = vld [vmem:[%s4754_s25 + $0xc8] sm:$0xff] }
  0x13   : > { %v4760_v4 = vld [vmem:[%s4754_s25 + $0x1c0] sm:$0xff]  ;;  %4195 = vmatprep.mubr.msk.f32.mxu0 %vm310_vm1, %v4757_v3  ;;  %v4770_v6 = vld [vmem:[%s4754_s25 + $0x1c8] sm:$0xff] }
  0x14   : > { %4219 = vmatprep.mubr.msk.f32.mxu1 %vm310_vm1, %v4760_v4  ;;  %v4773_v7 = vld [vmem:[%s4754_s25 + $0xe0] sm:$0xff]  ;;  %4196 = vmatmul.mubr.msk.f32.vlgmr.msra.gmra.mxu0 %vm310_vm1, %v4763_v5  ;;  %v4795_v11 = vld [vmem:[%s4754_s25 + $0xe8] sm:$0xff] }
  0x15   : > { %v4776_v8 = vld [vmem:[%s4754_s25 + $0x1e0] sm:$0xff]  ;;  %4220 = vmatmul.mubr.msk.f32.vlgmr.msra.gmra.mxu1 %vm310_vm1, %v4770_v6  ;;  %4294 = vmatpush3.msk.msra.mxu0 %vm407_vm0, %v3654_v2  ;;  %v4798_v12 = vld [vmem:[%s4754_s25 + $0x1e8] sm:$0xff] }
  0x16   : > { %4244 = vmatpush3.msk.msra.mxu1 %vm407_vm0, %v307_v1  ;;  %4198 = vmatprep.mubr.msk.f32.mxu0 %vm310_vm1, %v4773_v7  ;;  %v4805_v13 = vld [vmem:[%s4754_s25 + $0x100] sm:$0xff]  ;;  %v4823_v15 = vld [vmem:[%s4754_s25 + $0x108] sm:$0xff] }
  0x17   : > { %4222 = vmatprep.mubr.msk.f32.mxu1 %vm310_vm1, %v4776_v8  ;;  %v4808_v14 = vld [vmem:[%s4754_s25 + $0x200] sm:$0xff]  ;;  %4343 = vmatprep.subr.msk.mxu1 %vm407_vm0, %v4785_v9  ;;  %v4826_v16 = vld [vmem:[%s4754_s25 + $0x208] sm:$0xff] }
  0x18   : > { %4393 = vmatprep.subr.msk.mxu0 %vm407_vm0, %v4790_v10  ;;  %4199 = vmatmul.mubr.msk.f32.gmra.mxu0 %vm310_vm1, %v4795_v11  ;;  %v4829_v17 = vld [vmem:[%s4754_s25 + $0x120] sm:$0xff]  ;;  %v4843_v19 = vld [vmem:[%s4754_s25 + $0x128] sm:$0xff] }
  0x19   : > { %4223 = vmatmul.mubr.msk.f32.gmra.mxu1 %vm310_vm1, %v4798_v12  ;;  %4201 = vmatprep.mubr.msk.f32.mxu0 %vm310_vm1, %v4805_v13  ;;  %v4832_v18 = vld [vmem:[%s4754_s25 + $0x220] sm:$0xff]  ;;  %v4846_v20 = vld [vmem:[%s4754_s25 + $0x228] sm:$0xff] }
  0x1a   : > { %4225 = vmatprep.mubr.msk.f32.mxu1 %vm310_vm1, %v4808_v14  ;;  %v4849_v21 = vld [vmem:[%s4754_s25 + $0x140] sm:$0xff]  ;;  %v4863_v23 = vld [vmem:[%s4754_s25 + $0x148] sm:$0xff] }
  0x1b   : > { %v4852_v22 = vld [vmem:[%s4754_s25 + $0x240] sm:$0xff]  ;;  %v4866_v24 = vld [vmem:[%s4754_s25 + $0x248] sm:$0xff] }
  0x1c   : > { %4202 = vmatmul.mubr.msk.f32.gmra.mxu0 %vm310_vm1, %v4823_v15  ;;  %v4869_v25 = vld [vmem:[%s4754_s25 + $0x160] sm:$0xff]  ;;  %v4883_v27 = vld [vmem:[%s4754_s25 + $0x168] sm:$0xff] }
  0x1d   : > { %4226 = vmatmul.mubr.msk.f32.gmra.mxu1 %vm310_vm1, %v4826_v16  ;;  %4204 = vmatprep.mubr.msk.f32.mxu0 %vm310_vm1, %v4829_v17  ;;  %v4872_v26 = vld [vmem:[%s4754_s25 + $0x260] sm:$0xff]  ;;  %v4886_v28 = vld [vmem:[%s4754_s25 + $0x268] sm:$0xff] }
  0x1e   : > { %4228 = vmatprep.mubr.msk.f32.mxu1 %vm310_vm1, %v4832_v18  ;;  %v4889_v29 = vld [vmem:[%s4754_s25 + $0x180] sm:$0xff]  ;;  %v4903_v31 = vld [vmem:[%s4754_s25 + $0x188] sm:$0xff] }
  0x1f   : > { %v4892_v30 = vld [vmem:[%s4754_s25 + $0x280] sm:$0xff]  ;;  %v4906_v32 = vld [vmem:[%s4754_s25 + $0x288] sm:$0xff] }
  0x20   : > { %4205 = vmatmul.mubr.msk.f32.gmra.mxu0 %vm310_vm1, %v4843_v19  ;;  %v4909_v33 = vld [vmem:[%s4754_s25 + $0x1a0] sm:$0xff]  ;;  %v4923_v35 = vld [vmem:[%s4754_s25 + $0x1a8] sm:$0xff] }
  0x21   : > { %4229 = vmatmul.mubr.msk.f32.gmra.mxu1 %vm310_vm1, %v4846_v20  ;;  %4207 = vmatprep.mubr.msk.f32.mxu0 %vm310_vm1, %v4849_v21  ;;  %v4912_v34 = vld [vmem:[%s4754_s25 + $0x2a0] sm:$0xff]  ;;  %v294_v36 = vld [vmem:[%s4754_s25 + $0x2a8] sm:$0xff] }
  0x22   : > { %4231 = vmatprep.mubr.msk.f32.mxu1 %vm310_vm1, %v4852_v22  ;;  %v251_v37 = vld [vmem:[%s4754_s25] sm:$0xff]  ;;  %v252_v38 = vld [vmem:[%s4754_s25 + $0x8] sm:$0xff] }
  0x23   : > { %v253_v39 = vld [vmem:[%s4754_s25 + $0x20] sm:$0xff]  ;;  %v254_v42 = vld [vmem:[%s4754_s25 + $0x28] sm:$0xff] }
  0x24   : > { %4208 = vmatmul.mubr.msk.f32.gmra.mxu0 %vm310_vm1, %v4863_v23  ;;  %v255_v43 = vld [vmem:[%s4754_s25 + $0x40] sm:$0xff]  ;;  %v256_v44 = vld [vmem:[%s4754_s25 + $0x48] sm:$0xff] }
  0x25   : > { %4232 = vmatmul.mubr.msk.f32.gmra.mxu1 %vm310_vm1, %v4866_v24  ;;  %4210 = vmatprep.mubr.msk.f32.mxu0 %vm310_vm1, %v4869_v25  ;;  %v257_v45 = vld [vmem:[%s4754_s25 + $0x60] sm:$0xff]  ;;  %v258_v46 = vld [vmem:[%s4754_s25 + $0x68] sm:$0xff] }
  0x26   : > { %4234 = vmatprep.mubr.msk.f32.mxu1 %vm310_vm1, %v4872_v26  ;;  %v259_v47 = vld [vmem:[%s4754_s25 + $0x80] sm:$0xff]  ;;  %v260_v48 = vld [vmem:[%s4754_s25 + $0x88] sm:$0xff] }
  0x27   : > { %v261_v49 = vld [vmem:[%s4754_s25 + $0xa0] sm:$0xff]  ;;  %v262_v50 = vld [vmem:[%s4754_s25 + $0xa8] sm:$0xff] }
  0x28   : > { %4211 = vmatmul.mubr.msk.f32.gmra.mxu0 %vm310_vm1, %v4883_v27  ;;  %v295_v51 = vld [vmem:[%s4754_s25 + $0x2c0] sm:$0xff]  ;;  %v296_v52 = vld [vmem:[%s4754_s25 + $0x2c8] sm:$0xff] }
  0x29   : > { %4235 = vmatmul.mubr.msk.f32.gmra.mxu1 %vm310_vm1, %v4886_v28  ;;  %4213 = vmatprep.mubr.msk.f32.mxu0 %vm310_vm1, %v4889_v29  ;;  %v297_v53 = vld [vmem:[%s4754_s25 + $0x2e0] sm:$0xff]  ;;  %v298_v54 = vld [vmem:[%s4754_s25 + $0x2e8] sm:$0xff] }
  0x2a   : > { %4237 = vmatprep.mubr.msk.f32.mxu1 %vm310_vm1, %v4892_v30  ;;  %v299_v55 = vld [vmem:[%s4754_s25 + $0x300] sm:$0xff]  ;;  %v300_v56 = vld [vmem:[%s4754_s25 + $0x308] sm:$0xff] }
  0x2b   : > { %v301_v57 = vld [vmem:[%s4754_s25 + $0x320] sm:$0xff]  ;;  %v302_v58 = vld [vmem:[%s4754_s25 + $0x328] sm:$0xff] }
  0x2c   : > { %4214 = vmatmul.mubr.msk.f32.gmra.mxu0 %vm310_vm1, %v4903_v31  ;;  %v303_v59 = vld [vmem:[%s4754_s25 + $0x340] sm:$0xff]  ;;  %v304_v60 = vld [vmem:[%s4754_s25 + $0x348] sm:$0xff] }
  0x2d   : > { %4238 = vmatmul.mubr.msk.f32.gmra.mxu1 %vm310_vm1, %v4906_v32  ;;  %4216 = vmatprep.mubr.msk.f32.mxu0 %vm310_vm1, %v4909_v33  ;;  %v305_v61 = vld [vmem:[%s4754_s25 + $0x360] sm:$0xff]  ;;  %v306_v62 = vld [vmem:[%s4754_s25 + $0x368] sm:$0xff] }
  0x2e   : > { %4240 = vmatprep.mubr.msk.f32.mxu1 %vm310_vm1, %v4912_v34  ;;  %v1198_v63 = vld [vmem:[%s4754_s25 + $0x6] sm:$0xff]  ;;  %v1199_v1 = vld [vmem:[%s4754_s25 + $0xe] sm:$0xff] }
  0x2f   : > { %v1210_v0 = vld [vmem:[%s4754_s25 + $0xc6] sm:$0xff]  ;;  %v1211_v2 = vld [vmem:[%s4754_s25 + $0xce] sm:$0xff] }
  0x30   : > { %4217 = vmatmul.mubr.msk.f32.gmra.mxu0 %vm310_vm1, %v4923_v35 }
  0x31   : > { %4241 = vmatmul.mubr.msk.f32.gmra.mxu1 %vm310_vm1, %v294_v36  ;;  %4295 = vmatprep.mubr.msk.f32.mxu0 %vm310_vm1, %v4889_v29 }
  0x32   : > { %4245 = vmatprep.mubr.msk.f32.mxu1 %vm310_vm1, %v251_v37  ;;  %v5207_v37 = vld [vmem:[%s4754_s25 + $0x246] sm:$0xff] }
  0x34   : > { %4296 = vmatmul.mubr.msk.f32.vlgmr.msra.gmra.mxu0 %vm310_vm1, %v4903_v31 }
  0x35   : > { %4246 = vmatmul.mubr.msk.f32.vlgmr.msra.gmra.mxu1 %vm310_vm1, %v252_v38  ;;  %4394 = vmatpush3.msk.msra.mxu0 %vm407_vm0, %v4790_v10  ;;  %v1214_v10 = vld [vmem:[%s4754_s25 + $0x106] sm:$0xff]  ;;  %v5217_v38 = vld [vmem:[%s4754_s25 + $0x24e] sm:$0xff] }
  0x36   : > { %4344 = vmatpush3.msk.msra.mxu1 %vm407_vm0, %v4785_v9  ;;  %4248 = vmatprep.mubr.msk.f32.mxu1 %vm310_vm1, %v253_v39  ;;  %v1202_v9 = vld [vmem:[%s4754_s25 + $0x46] sm:$0xff] }
  0x37   : > { %4298 = vmatprep.mubr.msk.f32.mxu0 %vm310_vm1, %v4909_v33  ;;  %4443 = vmatprep.subr.msk.mxu1 %vm407_vm0, %v4941_v40  ;;  %v5220_v39 = vld [vmem:[%s4754_s25 + $0x266] sm:$0xff] }
  0x38   : > { %4493 = vmatprep.subr.msk.mxu0 %vm407_vm0, %v4946_v41  ;;  %4299 = vmatmul.mubr.msk.f32.gmra.mxu0 %vm310_vm1, %v4923_v35 }
  0x39   : > { %4249 = vmatmul.mubr.msk.f32.gmra.mxu1 %vm310_vm1, %v254_v42  ;;  %4301 = vmatprep.mubr.msk.f32.mxu0 %vm310_vm1, %v4760_v4  ;;  %v5244_v42 = vld [vmem:[%s4754_s25 + $0x28e] sm:$0xff] }
  0x3a   : > { %4251 = vmatprep.mubr.msk.f32.mxu1 %vm310_vm1, %v255_v43  ;;  %v5247_v43 = vld [vmem:[%s4754_s25 + $0x2a6] sm:$0xff] }
  0x3c   : > { %4302 = vmatmul.mubr.msk.f32.gmra.mxu0 %vm310_vm1, %v4770_v6 }
  0x3d   : > { %4252 = vmatmul.mubr.msk.f32.gmra.mxu1 %vm310_vm1, %v256_v44  ;;  %4304 = vmatprep.mubr.msk.f32.mxu0 %vm310_vm1, %v4776_v8  ;;  %v5258_v44 = vld [vmem:[%s4754_s25 + $0x2ae] sm:$0xff] }
  0x3e   : > { %4254 = vmatprep.mubr.msk.f32.mxu1 %vm310_vm1, %v257_v45  ;;  %v2208_v45 = vld [vmem:[%s4754_s25 + $0xc] sm:$0xff] }
  0x40   : > { %4305 = vmatmul.mubr.msk.f32.gmra.mxu0 %vm310_vm1, %v4798_v12 }
  0x41   : > { %4255 = vmatmul.mubr.msk.f32.gmra.mxu1 %vm310_vm1, %v258_v46  ;;  %4307 = vmatprep.mubr.msk.f32.mxu0 %vm310_vm1, %v4808_v14  ;;  %v1216_v14 = vld [vmem:[%s4754_s25 + $0x126] sm:$0xff]  ;;  %v2209_v46 = vld [vmem:[%s4754_s25 + $0x14] sm:$0xff] }
  0x42   : > { %4257 = vmatprep.mubr.msk.f32.mxu1 %vm310_vm1, %v259_v47  ;;  %v2210_v47 = vld [vmem:[%s4754_s25 + $0x2c] sm:$0xff] }
  0x44   : > { %4308 = vmatmul.mubr.msk.f32.gmra.mxu0 %vm310_vm1, %v4826_v16  ;;  %v1217_v16 = vld [vmem:[%s4754_s25 + $0x12e] sm:$0xff] }
  0x45   : > { %4258 = vmatmul.mubr.msk.f32.gmra.mxu1 %vm310_vm1, %v260_v48  ;;  %4310 = vmatprep.mubr.msk.f32.mxu0 %vm310_vm1, %v4832_v18  ;;  %v1218_v18 = vld [vmem:[%s4754_s25 + $0x146] sm:$0xff]  ;;  %v2211_v48 = vld [vmem:[%s4754_s25 + $0x34] sm:$0xff] }
  0x46   : > { %4260 = vmatprep.mubr.msk.f32.mxu1 %vm310_vm1, %v261_v49  ;;  %v2212_v49 = vld [vmem:[%s4754_s25 + $0x4c] sm:$0xff] }
  0x48   : > { %4311 = vmatmul.mubr.msk.f32.gmra.mxu0 %vm310_vm1, %v4846_v20  ;;  %v1219_v20 = vld [vmem:[%s4754_s25 + $0x14e] sm:$0xff] }
  0x49   : > { %4261 = vmatmul.mubr.msk.f32.gmra.mxu1 %vm310_vm1, %v262_v50  ;;  %4313 = vmatprep.mubr.msk.f32.mxu0 %vm310_vm1, %v4852_v22  ;;  %v1220_v22 = vld [vmem:[%s4754_s25 + $0x166] sm:$0xff]  ;;  %v2213_v50 = vld [vmem:[%s4754_s25 + $0x54] sm:$0xff] }
  0x4a   : > { %4263 = vmatprep.mubr.msk.f32.mxu1 %vm310_vm1, %v4757_v3  ;;  %v1200_v3 = vld [vmem:[%s4754_s25 + $0x26] sm:$0xff] }
  0x4c   : > { %4314 = vmatmul.mubr.msk.f32.gmra.mxu0 %vm310_vm1, %v4866_v24  ;;  %v1221_v24 = vld [vmem:[%s4754_s25 + $0x16e] sm:$0xff] }
  0x4d   : > { %4264 = vmatmul.mubr.msk.f32.gmra.mxu1 %vm310_vm1, %v4763_v5  ;;  %4316 = vmatprep.mubr.msk.f32.mxu0 %vm310_vm1, %v4872_v26  ;;  %v5087_v5 = vld [vmem:[%s6178_s1 + $0x14] sm:$0xf] }
  0x4e   : > { %4266 = vmatprep.mubr.msk.f32.mxu1 %vm310_vm1, %v4773_v7  ;;  %v1201_v7 = vld [vmem:[%s4754_s25 + $0x2e] sm:$0xff] }
  0x4f   : > { %v1223_v26 = vld [vmem:[%s4754_s25 + $0x18e] sm:$0xff] }
  0x50   : > { %4317 = vmatmul.mubr.msk.f32.gmra.mxu0 %vm310_vm1, %v4886_v28  ;;  %v5156_v28 = vld [vmem:[%s4754_s25 + $0x1ae] sm:$0xff] }
  0x51   : > { %4267 = vmatmul.mubr.msk.f32.gmra.mxu1 %vm310_vm1, %v4795_v11  ;;  %4319 = vmatprep.mubr.msk.f32.mxu0 %vm310_vm1, %v4892_v30  ;;  %v1203_v11 = vld [vmem:[%s4754_s25 + $0x4e] sm:$0xff] }
  0x52   : > { %4269 = vmatprep.mubr.msk.f32.mxu1 %vm310_vm1, %v4805_v13  ;;  %v1204_v13 = vld [vmem:[%s4754_s25 + $0x66] sm:$0xff]  ;;  %v5168_v30 = vld [vmem:[%s4754_s25 + $0x1ce] sm:$0xff] }
  0x54   : > { %4320 = vmatmul.mubr.msk.f32.gmra.mxu0 %vm310_vm1, %v4906_v32  ;;  %v5180_v32 = vld [vmem:[%s4754_s25 + $0x1ee] sm:$0xff] }
  0x55   : > { %4270 = vmatmul.mubr.msk.f32.gmra.mxu1 %vm310_vm1, %v4823_v15  ;;  %4322 = vmatprep.mubr.msk.f32.mxu0 %vm310_vm1, %v4912_v34  ;;  %v1205_v15 = vld [vmem:[%s4754_s25 + $0x6e] sm:$0xff] }
  0x56   : > { %4272 = vmatprep.mubr.msk.f32.mxu1 %vm310_vm1, %v4829_v17  ;;  %v1206_v17 = vld [vmem:[%s4754_s25 + $0x86] sm:$0xff]  ;;  %v5192_v34 = vld [vmem:[%s4754_s25 + $0x20e] sm:$0xff] }
  0x58   : > { %4323 = vmatmul.mubr.msk.f32.gmra.mxu0 %vm310_vm1, %v294_v36  ;;  %v5204_v36 = vld [vmem:[%s4754_s25 + $0x22e] sm:$0xff] }
  0x59   : > { %4273 = vmatmul.mubr.msk.f32.gmra.mxu1 %vm310_vm1, %v4843_v19  ;;  %4325 = vmatprep.mubr.msk.f32.mxu0 %vm310_vm1, %v295_v51  ;;  %v1207_v19 = vld [vmem:[%s4754_s25 + $0x8e] sm:$0xff] }
  0x5a   : > { %4275 = vmatprep.mubr.msk.f32.mxu1 %vm310_vm1, %v4849_v21  ;;  %v1208_v21 = vld [vmem:[%s4754_s25 + $0xa6] sm:$0xff] }
  0x5b   : > { %v2214_v51 = vld [vmem:[%s4754_s25 + $0x6c] sm:$0xff] }
  0x5c   : > { %4326 = vmatmul.mubr.msk.f32.gmra.mxu0 %vm310_vm1, %v296_v52  ;;  %v2215_v52 = vld [vmem:[%s4754_s25 + $0x74] sm:$0xff] }
  0x5d   : > { %4276 = vmatmul.mubr.msk.f32.gmra.mxu1 %vm310_vm1, %v4863_v23  ;;  %4328 = vmatprep.mubr.msk.f32.mxu0 %vm310_vm1, %v297_v53  ;;  %v1209_v23 = vld [vmem:[%s4754_s25 + $0xae] sm:$0xff] }
  0x5e   : > { %4278 = vmatprep.mubr.msk.f32.mxu1 %vm310_vm1, %v4869_v25  ;;  %v5139_v25 = vld [vmem:[%s4754_s25 + $0x186] sm:$0xff] }
  0x5f   : > { %v2216_v53 = vld [vmem:[%s4754_s25 + $0x8c] sm:$0xff] }
  0x60   : > { %4329 = vmatmul.mubr.msk.f32.gmra.mxu0 %vm310_vm1, %v298_v54  ;;  %v2217_v54 = vld [vmem:[%s4754_s25 + $0x94] sm:$0xff] }
  0x61   : > { %4279 = vmatmul.mubr.msk.f32.gmra.mxu1 %vm310_vm1, %v4883_v27  ;;  %4331 = vmatprep.mubr.msk.f32.mxu0 %vm310_vm1, %v299_v55  ;;  %v5148_v27 = vld [vmem:[%s4754_s25 + $0x1a6] sm:$0xff] }
  0x62   : > { %4281 = vmatprep.mubr.msk.f32.mxu1 %vm310_vm1, %v4889_v29  ;;  %v5159_v29 = vld [vmem:[%s4754_s25 + $0x1c6] sm:$0xff] }
  0x63   : > { %v2218_v55 = vld [vmem:[%s4754_s25 + $0xac] sm:$0xff] }
  0x64   : > { %4332 = vmatmul.mubr.msk.f32.gmra.mxu0 %vm310_vm1, %v300_v56  ;;  %v2219_v56 = vld [vmem:[%s4754_s25 + $0xb4] sm:$0xff] }
  0x65   : > { %4282 = vmatmul.mubr.msk.f32.gmra.mxu1 %vm310_vm1, %v4903_v31  ;;  %4334 = vmatprep.mubr.msk.f32.mxu0 %vm310_vm1, %v301_v57  ;;  %v5171_v31 = vld [vmem:[%s4754_s25 + $0x1e6] sm:$0xff] }
  0x66   : > { %4284 = vmatprep.mubr.msk.f32.mxu1 %vm310_vm1, %v4909_v33  ;;  %v5183_v33 = vld [vmem:[%s4754_s25 + $0x206] sm:$0xff] }
  0x67   : > { %v5313_v57 = vld [vmem:[%s4754_s25 + $0xcc] sm:$0xff] }
  0x68   : > { %4335 = vmatmul.mubr.msk.f32.gmra.mxu0 %vm310_vm1, %v302_v58  ;;  %v5323_v58 = vld [vmem:[%s4754_s25 + $0xd4] sm:$0xff] }
  0x69   : > { %4285 = vmatmul.mubr.msk.f32.gmra.mxu1 %vm310_vm1, %v4923_v35  ;;  %4337 = vmatprep.mubr.msk.f32.mxu0 %vm310_vm1, %v303_v59  ;;  %v5195_v35 = vld [vmem:[%s4754_s25 + $0x226] sm:$0xff] }
  0x6a   : > { %4287 = vmatprep.mubr.msk.f32.mxu1 %vm310_vm1, %v4760_v4  ;;  %v1212_v4 = vld [vmem:[%s4754_s25 + $0xe6] sm:$0xff] }
  0x6b   : > { %v5326_v59 = vld [vmem:[%s4754_s25 + $0xec] sm:$0xff] }
  0x6c   : > { %4338 = vmatmul.mubr.msk.f32.gmra.mxu0 %vm310_vm1, %v304_v60  ;;  %v5337_v60 = vld [vmem:[%s4754_s25 + $0xf4] sm:$0xff] }
  0x6d   : > { %4288 = vmatmul.mubr.msk.f32.gmra.mxu1 %vm310_vm1, %v4770_v6  ;;  %4340 = vmatprep.mubr.msk.f32.mxu0 %vm310_vm1, %v305_v61  ;;  %v5092_v6 = vld [vmem:[%s6178_s1 + $0x20] sm:$0xf]  ;;  %v5340_v61 = vld [vmem:[%s4754_s25 + $0x10c] sm:$0xff] }
  0x6e   : > { %4290 = vmatprep.mubr.msk.f32.mxu1 %vm310_vm1, %v4776_v8  ;;  %v1213_v8 = vld [vmem:[%s4754_s25 + $0xee] sm:$0xff] }
  0x70   : > { %4341 = vmatmul.mubr.msk.f32.gmra.mxu0 %vm310_vm1, %v306_v62  ;;  %v5351_v62 = vld [vmem:[%s4754_s25 + $0x114] sm:$0xff] }
  0x71   : > { %4291 = vmatmul.mubr.msk.f32.gmra.mxu1 %vm310_vm1, %v4798_v12  ;;  %4395 = vmatprep.mubr.msk.f32.mxu0 %vm310_vm1, %v1210_v0  ;;  %v1215_v12 = vld [vmem:[%s4754_s25 + $0x10e] sm:$0xff] }
  0x72   : > { %4345 = vmatprep.mubr.msk.f32.mxu1 %vm310_vm1, %v1198_v63  ;;  %v5354_v63 = vld [vmem:[%s4754_s25 + $0x12c] sm:$0xff] }
  0x74   : > { %4396 = vmatmul.mubr.msk.f32.vlgmr.msra.gmra.mxu0 %vm310_vm1, %v1211_v2 }
  0x75   : > { %4346 = vmatmul.mubr.msk.f32.vlgmr.msra.gmra.mxu1 %vm310_vm1, %v1199_v1  ;;  %4494 = vmatpush3.msk.msra.mxu0 %vm407_vm0, %v4946_v41  ;;  %v5233_v41 = vld [vmem:[%s4754_s25 + $0x286] sm:$0xff] }
  0x76   : > { %4444 = vmatpush3.msk.msra.mxu1 %vm407_vm0, %v4941_v40  ;;  %4348 = vmatprep.mubr.msk.f32.mxu1 %vm310_vm1, %v1200_v3  ;;  %v5230_v40 = vld [vmem:[%s4754_s25 + $0x26e] sm:$0xff] }
  0x77   : > { %4398 = vmatprep.mubr.msk.f32.mxu0 %vm310_vm1, %v1212_v4  ;;  %4543 = vmatprep.subr.msk.mxu1 %vm407_vm0, %v5087_v5 }
  0x78   : > { %4593 = vmatprep.subr.msk.mxu0 %vm407_vm0, %v5092_v6  ;;  %4399 = vmatmul.mubr.msk.f32.gmra.mxu0 %vm310_vm1, %v1213_v8 }
  0x79   : > { %4349 = vmatmul.mubr.msk.f32.gmra.mxu1 %vm310_vm1, %v1201_v7  ;;  %4401 = vmatprep.mubr.msk.f32.mxu0 %vm310_vm1, %v1214_v10 }
  0x7a   : > { %4351 = vmatprep.mubr.msk.f32.mxu1 %vm310_vm1, %v1202_v9  ;;  %v1243_v9 = vld [vmem:[%s4754_s25 + $0x2ce] sm:$0xff] }
  0x7c   : > { %4402 = vmatmul.mubr.msk.f32.gmra.mxu0 %vm310_vm1, %v1215_v12 }
  0x7d   : > { %4352 = vmatmul.mubr.msk.f32.gmra.mxu1 %vm310_vm1, %v1203_v11  ;;  %4404 = vmatprep.mubr.msk.f32.mxu0 %vm310_vm1, %v1216_v14 }
  0x7e   : > { %4354 = vmatprep.mubr.msk.f32.mxu1 %vm310_vm1, %v1204_v13  ;;  %v1244_v13 = vld [vmem:[%s4754_s25 + $0x2e6] sm:$0xff] }
  0x80   : > { %4405 = vmatmul.mubr.msk.f32.gmra.mxu0 %vm310_vm1, %v1217_v16 }
  0x81   : > { %4355 = vmatmul.mubr.msk.f32.gmra.mxu1 %vm310_vm1, %v1205_v15  ;;  %4407 = vmatprep.mubr.msk.f32.mxu0 %vm310_vm1, %v1218_v18 }
  0x82   : > { %4357 = vmatprep.mubr.msk.f32.mxu1 %vm310_vm1, %v1206_v17  ;;  %v1245_v17 = vld [vmem:[%s4754_s25 + $0x2ee] sm:$0xff] }
  0x84   : > { %4408 = vmatmul.mubr.msk.f32.gmra.mxu0 %vm310_vm1, %v1219_v20 }
  0x85   : > { %4358 = vmatmul.mubr.msk.f32.gmra.mxu1 %vm310_vm1, %v1207_v19  ;;  %4410 = vmatprep.mubr.msk.f32.mxu0 %vm310_vm1, %v1220_v22 }
  0x86   : > { %4360 = vmatprep.mubr.msk.f32.mxu1 %vm310_vm1, %v1208_v21  ;;  %v1246_v21 = vld [vmem:[%s4754_s25 + $0x306] sm:$0xff] }
  0x88   : > { %4411 = vmatmul.mubr.msk.f32.gmra.mxu0 %vm310_vm1, %v1221_v24 }
  0x89   : > { %4361 = vmatmul.mubr.msk.f32.gmra.mxu1 %vm310_vm1, %v1209_v23  ;;  %4413 = vmatprep.mubr.msk.f32.mxu0 %vm310_vm1, %v5139_v25 }
  0x8a   : > { %4363 = vmatprep.mubr.msk.f32.mxu1 %vm310_vm1, %v1210_v0 }
  0x8c   : > { %4414 = vmatmul.mubr.msk.f32.gmra.mxu0 %vm310_vm1, %v1223_v26 }
  0x8d   : > { %4364 = vmatmul.mubr.msk.f32.gmra.mxu1 %vm310_vm1, %v1211_v2  ;;  %4416 = vmatprep.mubr.msk.f32.mxu0 %vm310_vm1, %v5148_v27  ;;  %v5369_v2 = vld [vmem:[%s4754_s25 + $0x134] sm:$0xff] }
  0x8e   : > { %4366 = vmatprep.mubr.msk.f32.mxu1 %vm310_vm1, %v1212_v4 }
  0x90   : > { %4417 = vmatmul.mubr.msk.f32.gmra.mxu0 %vm310_vm1, %v5156_v28 }
  0x91   : > { %4367 = vmatmul.mubr.msk.f32.gmra.mxu1 %vm310_vm1, %v1213_v8  ;;  %4419 = vmatprep.mubr.msk.f32.mxu0 %vm310_vm1, %v5159_v29 }
  0x92   : > { %4369 = vmatprep.mubr.msk.f32.mxu1 %vm310_vm1, %v1214_v10  ;;  %v5392_v10 = vld [vmem:[%s4754_s25 + $0x154] sm:$0xff] }
  0x94   : > { %4420 = vmatmul.mubr.msk.f32.gmra.mxu0 %vm310_vm1, %v5168_v30 }
  0x95   : > { %4370 = vmatmul.mubr.msk.f32.gmra.mxu1 %vm310_vm1, %v1215_v12  ;;  %4422 = vmatprep.mubr.msk.f32.mxu0 %vm310_vm1, %v5171_v31 }
  0x96   : > { %4372 = vmatprep.mubr.msk.f32.mxu1 %vm310_vm1, %v1216_v14  ;;  %v5400_v14 = vld [vmem:[%s4754_s25 + $0x16c] sm:$0xff] }
  0x98   : > { %4423 = vmatmul.mubr.msk.f32.gmra.mxu0 %vm310_vm1, %v5180_v32 }
  0x99   : > { %4373 = vmatmul.mubr.msk.f32.gmra.mxu1 %vm310_vm1, %v1217_v16  ;;  %4425 = vmatprep.mubr.msk.f32.mxu0 %vm310_vm1, %v5183_v33 }
  0x9a   : > { %4375 = vmatprep.mubr.msk.f32.mxu1 %vm310_vm1, %v1218_v18  ;;  %v5414_v18 = vld [vmem:[%s4754_s25 + $0x174] sm:$0xff] }
  0x9c   : > { %4426 = vmatmul.mubr.msk.f32.gmra.mxu0 %vm310_vm1, %v5192_v34 }
  0x9d   : > { %4376 = vmatmul.mubr.msk.f32.gmra.mxu1 %vm310_vm1, %v1219_v20  ;;  %4428 = vmatprep.mubr.msk.f32.mxu0 %vm310_vm1, %v5195_v35 }
  0x9e   : > { %4378 = vmatprep.mubr.msk.f32.mxu1 %vm310_vm1, %v1220_v22  ;;  %v5422_v22 = vld [vmem:[%s4754_s25 + $0x18c] sm:$0xff] }
  0xa0   : > { %4429 = vmatmul.mubr.msk.f32.gmra.mxu0 %vm310_vm1, %v5204_v36 }
  0xa1   : > { %4379 = vmatmul.mubr.msk.f32.gmra.mxu1 %vm310_vm1, %v1221_v24  ;;  %4431 = vmatprep.mubr.msk.f32.mxu0 %vm310_vm1, %v5207_v37 }
  0xa2   : > { %4381 = vmatprep.mubr.msk.f32.mxu1 %vm310_vm1, %v5139_v25 }
  0xa4   : > { %4432 = vmatmul.mubr.msk.f32.gmra.mxu0 %vm310_vm1, %v5217_v38 }
  0xa5   : > { %4382 = vmatmul.mubr.msk.f32.gmra.mxu1 %vm310_vm1, %v1223_v26  ;;  %4434 = vmatprep.mubr.msk.f32.mxu0 %vm310_vm1, %v5220_v39 }
  0xa6   : > { %4384 = vmatprep.mubr.msk.f32.mxu1 %vm310_vm1, %v5148_v27 }
  0xa8   : > { %4435 = vmatmul.mubr.msk.f32.gmra.mxu0 %vm310_vm1, %v5230_v40 }
  0xa9   : > { %4385 = vmatmul.mubr.msk.f32.gmra.mxu1 %vm310_vm1, %v5156_v28  ;;  %4437 = vmatprep.mubr.msk.f32.mxu0 %vm310_vm1, %v5233_v41 }
  0xaa   : > { %4387 = vmatprep.mubr.msk.f32.mxu1 %vm310_vm1, %v5159_v29 }
  0xac   : > { %4438 = vmatmul.mubr.msk.f32.gmra.mxu0 %vm310_vm1, %v5244_v42 }
  0xad   : > { %4388 = vmatmul.mubr.msk.f32.gmra.mxu1 %vm310_vm1, %v5168_v30  ;;  %4440 = vmatprep.mubr.msk.f32.mxu0 %vm310_vm1, %v5247_v43 }
  0xae   : > { %4390 = vmatprep.mubr.msk.f32.mxu1 %vm310_vm1, %v5171_v31 }
  0xb0   : > { %4441 = vmatmul.mubr.msk.f32.gmra.mxu0 %vm310_vm1, %v5258_v44 }
  0xb1   : > { %4391 = vmatmul.mubr.msk.f32.gmra.mxu1 %vm310_vm1, %v5180_v32  ;;  %4495 = vmatprep.mubr.msk.f32.mxu0 %vm310_vm1, %v2208_v45  ;;  %v1252_v45 = vld [vmem:[%s4754_s25 + $0x366] sm:$0xff] }
  0xb2   : > { %4445 = vmatprep.mubr.msk.f32.mxu1 %vm310_vm1, %v5139_v25  ;;  %v1247_v25 = vld [vmem:[%s4754_s25 + $0x30e] sm:$0xff] }
  0xb4   : > { %4496 = vmatmul.mubr.msk.f32.vlgmr.msra.gmra.mxu0 %vm310_vm1, %v2209_v46  ;;  %v5488_v46 = vld [vmem:[%s4754_s25 + $0x1ec] sm:$0xff] }
  0xb5   : > { %4446 = vmatmul.mubr.msk.f32.vlgmr.msra.gmra.mxu1 %vm310_vm1, %v1223_v26  ;;  %4594 = vmatpush3.msk.msra.mxu0 %vm407_vm0, %v5092_v6  ;;  %v5377_v6 = vld [vmem:[%s4754_s25 + $0x14c] sm:$0xff]  ;;  %v5436_v26 = vld [vmem:[%s4754_s25 + $0x194] sm:$0xff] }
  0xb6   : > { %4544 = vmatpush3.msk.msra.mxu1 %vm407_vm0, %v5087_v5  ;;  %4448 = vmatprep.mubr.msk.f32.mxu1 %vm310_vm1, %v5148_v27  ;;  %v1242_v5 = vld [vmem:[%s4754_s25 + $0x2c6] sm:$0xff] }
  0xb7   : > { %4498 = vmatprep.mubr.msk.f32.mxu0 %vm310_vm1, %v2210_v47 }
  0xb8   : > { %4499 = vmatmul.mubr.msk.f32.gmra.mxu0 %vm310_vm1, %v2211_v48 }
  0xb9   : > { %4449 = vmatmul.mubr.msk.f32.gmra.mxu1 %vm310_vm1, %v5156_v28  ;;  %4501 = vmatprep.mubr.msk.f32.mxu0 %vm310_vm1, %v2212_v49  ;;  %v1253_v49 = vld [vmem:[%s4754_s25 + $0x36e] sm:$0xff] }
  0xba   : > { %4451 = vmatprep.mubr.msk.f32.mxu1 %vm310_vm1, %v5159_v29  ;;  %v1248_v29 = vld [vmem:[%s4754_s25 + $0x326] sm:$0xff] }
  0xbc   : > { %4502 = vmatmul.mubr.msk.f32.gmra.mxu0 %vm310_vm1, %v2213_v50  ;;  %v5502_v50 = vld [vmem:[%s4754_s25 + $0x1f4] sm:$0xff] }
  0xbd   : > { %4452 = vmatmul.mubr.msk.f32.gmra.mxu1 %vm310_vm1, %v5168_v30  ;;  %4504 = vmatprep.mubr.msk.f32.mxu0 %vm310_vm1, %v2214_v51  ;;  %v5444_v30 = vld [vmem:[%s4754_s25 + $0x1ac] sm:$0xff] }
  0xbe   : > { %4454 = vmatprep.mubr.msk.f32.mxu1 %vm310_vm1, %v5171_v31 }
  0xc0   : > { %4505 = vmatmul.mubr.msk.f32.gmra.mxu0 %vm310_vm1, %v2215_v52 }
  0xc1   : > { %4455 = vmatmul.mubr.msk.f32.gmra.mxu1 %vm310_vm1, %v5180_v32  ;;  %4507 = vmatprep.mubr.msk.f32.mxu0 %vm310_vm1, %v2216_v53 }
  0xc2   : > { %4457 = vmatprep.mubr.msk.f32.mxu1 %vm310_vm1, %v5183_v33  ;;  %v1249_v33 = vld [vmem:[%s4754_s25 + $0x32e] sm:$0xff] }
  0xc4   : > { %4508 = vmatmul.mubr.msk.f32.gmra.mxu0 %vm310_vm1, %v2217_v54 }
  0xc5   : > { %4458 = vmatmul.mubr.msk.f32.gmra.mxu1 %vm310_vm1, %v5192_v34  ;;  %4510 = vmatprep.mubr.msk.f32.mxu0 %vm310_vm1, %v2218_v55  ;;  %v5458_v34 = vld [vmem:[%s4754_s25 + $0x1b4] sm:$0xff] }
  0xc6   : > { %4460 = vmatprep.mubr.msk.f32.mxu1 %vm310_vm1, %v5195_v35 }
  0xc8   : > { %4511 = vmatmul.mubr.msk.f32.gmra.mxu0 %vm310_vm1, %v2219_v56 }
  0xc9   : > { %4461 = vmatmul.mubr.msk.f32.gmra.mxu1 %vm310_vm1, %v5204_v36  ;;  %4513 = vmatprep.mubr.msk.f32.mxu0 %vm310_vm1, %v5313_v57 }
  0xca   : > { %4463 = vmatprep.mubr.msk.f32.mxu1 %vm310_vm1, %v5207_v37  ;;  %v1250_v37 = vld [vmem:[%s4754_s25 + $0x346] sm:$0xff] }
  0xcc   : > { %4514 = vmatmul.mubr.msk.f32.gmra.mxu0 %vm310_vm1, %v5323_v58 }
  0xcd   : > { %4464 = vmatmul.mubr.msk.f32.gmra.mxu1 %vm310_vm1, %v5217_v38  ;;  %4516 = vmatprep.mubr.msk.f32.mxu0 %vm310_vm1, %v5326_v59  ;;  %v5466_v38 = vld [vmem:[%s4754_s25 + $0x1cc] sm:$0xff] }
  0xce   : > { %4466 = vmatprep.mubr.msk.f32.mxu1 %vm310_vm1, %v5220_v39 }
  0xd0   : > { %4517 = vmatmul.mubr.msk.f32.gmra.mxu0 %vm310_vm1, %v5337_v60 }
  0xd1   : > { %4467 = vmatmul.mubr.msk.f32.gmra.mxu1 %vm310_vm1, %v5230_v40  ;;  %4519 = vmatprep.mubr.msk.f32.mxu0 %vm310_vm1, %v5340_v61 }
  0xd2   : > { %4469 = vmatprep.mubr.msk.f32.mxu1 %vm310_vm1, %v5233_v41  ;;  %v1251_v41 = vld [vmem:[%s4754_s25 + $0x34e] sm:$0xff] }
  0xd4   : > { %v5356_v0 = vpop.f32.mrf.mxu0  ;;  %4520 = vmatmul.mubr.msk.f32.gmra.mxu0 %vm310_vm1, %v5351_v62 }
  0xd5   : > { %v5358_v1 = vpop.f32.mrf.mxu1  ;;  %4470 = vmatmul.mubr.msk.f32.gmra.mxu1 %vm310_vm1, %v5244_v42  ;;  %4522 = vmatprep.mubr.msk.f32.mxu0 %vm310_vm1, %v5354_v63  ;;  %v5480_v42 = vld [vmem:[%s4754_s25 + $0x1d4] sm:$0xff] }
  0xd6   : > { %4472 = vmatprep.mubr.msk.f32.mxu1 %vm310_vm1, %v5247_v43  ;;  %v5371_v3 = vpop.f32.mrf.mxu0 }
  0xd7   : > { %v5373_v4 = vpop.f32.mrf.mxu1 }
  0xd8   : > { %v5379_v7 = vpop.f32.mrf.mxu0  ;;  %4523 = vmatmul.mubr.msk.f32.gmra.mxu0 %vm310_vm1, %v5369_v2 }
  0xd9   : > { %v5381_v8 = vpop.f32.mrf.mxu1  ;;  %4473 = vmatmul.mubr.msk.f32.gmra.mxu1 %vm310_vm1, %v5258_v44  ;;  %4525 = vmatprep.mubr.msk.f32.mxu0 %vm310_vm1, %v5377_v6 }
  0xda   : > { %4475 = vmatprep.mubr.msk.f32.mxu1 %vm310_vm1, %v1242_v5  ;;  %v5394_v11 = vpop.f32.mrf.mxu0 }
  0xdb   : > { %v5396_v12 = vpop.f32.mrf.mxu1 }
  0xdc   : > { %v5402_v15 = vpop.f32.mrf.mxu0  ;;  %4526 = vmatmul.mubr.msk.f32.gmra.mxu0 %vm310_vm1, %v5392_v10 }
  0xdd   : > { %v5404_v16 = vpop.f32.mrf.mxu1  ;;  %4476 = vmatmul.mubr.msk.f32.gmra.mxu1 %vm310_vm1, %v1243_v9  ;;  %4528 = vmatprep.mubr.msk.f32.mxu0 %vm310_vm1, %v5400_v14 }
  0xde   : > { %4478 = vmatprep.mubr.msk.f32.mxu1 %vm310_vm1, %v1244_v13  ;;  %v5416_v19 = vpop.f32.mrf.mxu0 }
  0xdf   : > { %v5418_v20 = vpop.f32.mrf.mxu1 }
  0xe0   : > { %v5424_v23 = vpop.f32.mrf.mxu0  ;;  %4529 = vmatmul.mubr.msk.f32.gmra.mxu0 %vm310_vm1, %v5414_v18 }
  0xe1   : > { %v5426_v24 = vpop.f32.mrf.mxu1  ;;  %4479 = vmatmul.mubr.msk.f32.gmra.mxu1 %vm310_vm1, %v1245_v17  ;;  %4531 = vmatprep.mubr.msk.f32.mxu0 %vm310_vm1, %v5422_v22 }
  0xe2   : > { %4481 = vmatprep.mubr.msk.f32.mxu1 %vm310_vm1, %v1246_v21  ;;  %v5438_v27 = vpop.f32.mrf.mxu0 }
  0xe3   : > { %v5440_v28 = vpop.f32.mrf.mxu1 }
  0xe4   : > { %v5446_v31 = vpop.f32.mrf.mxu0  ;;  %4532 = vmatmul.mubr.msk.f32.gmra.mxu0 %vm310_vm1, %v5436_v26 }
  0xe5   : > { %v5448_v32 = vpop.f32.mrf.mxu1  ;;  %4482 = vmatmul.mubr.msk.f32.gmra.mxu1 %vm310_vm1, %v1247_v25  ;;  %4534 = vmatprep.mubr.msk.f32.mxu0 %vm310_vm1, %v5444_v30 }
  0xe6   : > { %4484 = vmatprep.mubr.msk.f32.mxu1 %vm310_vm1, %v1248_v29  ;;  %v5460_v35 = vpop.f32.mrf.mxu0 }
  0xe7   : > { %v5462_v36 = vpop.f32.mrf.mxu1 }
  0xe8   : > { %v5468_v39 = vpop.f32.mrf.mxu0  ;;  %4535 = vmatmul.mubr.msk.f32.gmra.mxu0 %vm310_vm1, %v5458_v34 }
  0xe9   : > { %v5470_v40 = vpop.f32.mrf.mxu1  ;;  %4485 = vmatmul.mubr.msk.f32.gmra.mxu1 %vm310_vm1, %v1249_v33  ;;  %4537 = vmatprep.mubr.msk.f32.mxu0 %vm310_vm1, %v5466_v38 }
  0xea   : > { %4487 = vmatprep.mubr.msk.f32.mxu1 %vm310_vm1, %v1250_v37  ;;  %v5482_v43 = vpop.f32.mrf.mxu0 }
  0xeb   : > { %v5484_v44 = vpop.f32.mrf.mxu1 }
  0xec   : > { %v5490_v47 = vpop.f32.mrf.mxu0  ;;  %4538 = vmatmul.mubr.msk.f32.gmra.mxu0 %vm310_vm1, %v5480_v42 }
  0xed   : > { %v5492_v48 = vpop.f32.mrf.mxu1  ;;  %4488 = vmatmul.mubr.msk.f32.gmra.mxu1 %vm310_vm1, %v1251_v41  ;;  %4540 = vmatprep.mubr.msk.f32.mxu0 %vm310_vm1, %v5488_v46 }
  0xee   : > { %4490 = vmatprep.mubr.msk.f32.mxu1 %vm310_vm1, %v1252_v45  ;;  %v5504_v51 = vpop.f32.mrf.mxu0 }
  0xef   : > { %v5506_v52 = vpop.f32.mrf.mxu1 }
  0xf0   : > { %v5508_v53 = vpop.f32.mrf.mxu0  ;;  %4541 = vmatmul.mubr.msk.f32.gmra.mxu0 %vm310_vm1, %v5502_v50 }
  0xf1   : > { %v5510_v54 = vpop.f32.mrf.mxu1  ;;  %4491 = vmatmul.mubr.msk.f32.gmra.mxu1 %vm310_vm1, %v1253_v49  ;;  %4595 = vmatprep.mubr.msk.f32.mxu0 %vm310_vm1, %v5422_v22 }
  0xf2   : > { %4545 = vmatprep.mubr.msk.f32.mxu1 %vm310_vm1, %v5313_v57  ;;  %v5519_v55 = vpop.f32.mrf.mxu0 }
  0xf3   : > { %v5521_v56 = vpop.f32.mrf.mxu1 }
  0xf4   : > { %v4297_v9 = vpop.f32.mrf.mxu0  ;;  %4596 = vmatmul.mubr.msk.f32.vlgmr.msra.gmra.mxu0 %vm310_vm1, %v5436_v26 }
  0xf5   : > { %v4247_v5 = vpop.f32.mrf.mxu1  ;;  %4546 = vmatmul.mubr.msk.f32.vlgmr.msra.gmra.mxu1 %vm310_vm1, %v5323_v58  ;;  %4598 = vmatprep.mubr.msk.f32.mxu0 %vm310_vm1, %v5444_v30 }
  0xf6   : > { %v747_v13 = vadd.f32 %v4247_v5, %v5356_v0  ;;  %4548 = vmatprep.mubr.msk.f32.mxu1 %vm310_vm1, %v5326_v59  ;;  %v1007_v17 = vpop.f32.mrf.mxu0  ;;  %v5561_v5 = vld [vmem:[%s4754_s25 + $0x20c] sm:$0xff] }
  0xf7   : > { %v741_v57 = vpop.f32.mrf.mxu1 }
  0xf8   : > { %v5532_v21 = vadd.f32 %v4297_v9, %v747_v13  ;;  %v742_v25 = vadd.f32 %v741_v57, %v5371_v3  ;;  %v4300_v33 = vpop.f32.mrf.mxu0  ;;  %4599 = vmatmul.mubr.msk.f32.gmra.mxu0 %vm310_vm1, %v5458_v34 }
  0xf9   : > { %v4250_v29 = vpop.f32.mrf.mxu1  ;;  %4549 = vmatmul.mubr.msk.f32.gmra.mxu1 %vm310_vm1, %v5337_v60  ;;  %4601 = vmatprep.mubr.msk.f32.mxu0 %vm310_vm1, %v5466_v38 }
  0xfa   : > { %v5539_v58 = vadd.f32 %v1007_v17, %v742_v25  ;;  %v757_v59 = vadd.f32 %v4250_v29, %v5379_v7  ;;  %4551 = vmatprep.mubr.msk.f32.mxu1 %vm310_vm1, %v5340_v61  ;;  %v1017_v3 = vpop.f32.mrf.mxu0 }
  0xfb   : > { %v751_v0 = vpop.f32.mrf.mxu1 }
  0xfc   : > { %v5546_v37 = vadd.f32 %v4300_v33, %v757_v59  ;;  %v752_v60 = vadd.f32 %v751_v0, %v5394_v11  ;;  %v4303_v45 = vpop.f32.mrf.mxu0  ;;  %4602 = vmatmul.mubr.msk.f32.gmra.mxu0 %vm310_vm1, %v5480_v42 }
  0xfd   : > { %v4253_v41 = vpop.f32.mrf.mxu1  ;;  %4552 = vmatmul.mubr.msk.f32.gmra.mxu1 %vm310_vm1, %v5351_v62  ;;  %4604 = vmatprep.mubr.msk.f32.mxu0 %vm310_vm1, %v5488_v46 }
  0xfe   : > { %v5553_v7 = vadd.f32 %v1017_v3, %v752_v60  ;;  %v767_v61 = vadd.f32 %v4253_v41, %v5402_v15  ;;  %4554 = vmatprep.mubr.msk.f32.mxu1 %vm310_vm1, %v5354_v63  ;;  %v1027_v49 = vpop.f32.mrf.mxu0 }
  0xff   : > { %v761_v11 = vpop.f32.mrf.mxu1 }
 0x100   : > { %v5563_v62 = vadd.f32 %v4303_v45, %v767_v61  ;;  %v762_v9 = vadd.f32 %v761_v11, %v5416_v19  ;;  %v4306_v57 = vpop.f32.mrf.mxu0  ;;  %4605 = vmatmul.mubr.msk.f32.gmra.mxu0 %vm310_vm1, %v5502_v50  ;;  %v5578_v19 = vld [vmem:[%s4754_s25 + $0x214] sm:$0xff] }
 0x101   : > { %v4256_v13 = vpop.f32.mrf.mxu1  ;;  %4555 = vmatmul.mubr.msk.f32.gmra.mxu1 %vm310_vm1, %v5369_v2  ;;  %4607 = vmatprep.mubr.msk.f32.mxu0 %vm310_vm1, %v5561_v5  ;;  %v5581_v2 = vld [vmem:[%s4754_s25 + $0x22c] sm:$0xff] }
 0x102   : > { %v5570_v63 = vadd.f32 %v1027_v49, %v762_v9  ;;  %v777_v15 = vadd.f32 %v4256_v13, %v5424_v23  ;;  %4557 = vmatprep.mubr.msk.f32.mxu1 %vm310_vm1, %v5377_v6  ;;  %v1037_v25 = vpop.f32.mrf.mxu0 }
 0x103   : > { %v771_v17 = vpop.f32.mrf.mxu1 }
 0x104   : > { %v5583_v29 = vadd.f32 %v4306_v57, %v777_v15  ;;  %v772_v33 = vadd.f32 %v771_v17, %v5438_v27  ;;  %v4309_v23 = vpop.f32.mrf.mxu0  ;;  %4608 = vmatmul.mubr.msk.f32.gmra.mxu0 %vm310_vm1, %v5578_v19  ;;  %v5598_v27 = vld [vmem:[%s4754_s25 + $0x234] sm:$0xff] }
 0x105   : > { %v4259_v59 = vpop.f32.mrf.mxu1  ;;  %4558 = vmatmul.mubr.msk.f32.gmra.mxu1 %vm310_vm1, %v5392_v10  ;;  %4610 = vmatprep.mubr.msk.f32.mxu0 %vm310_vm1, %v5581_v2  ;;  %v5601_v10 = vld [vmem:[%s4754_s25 + $0x24c] sm:$0xff] }
 0x106   : > { %v5590_v6 = vadd.f32 %v1037_v25, %v772_v33  ;;  %v787_v0 = vadd.f32 %v4259_v59, %v5446_v31  ;;  %4560 = vmatprep.mubr.msk.f32.mxu1 %vm310_vm1, %v5400_v14  ;;  %v1047_v60 = vpop.f32.mrf.mxu0 }
 0x107   : > { %v781_v3 = vpop.f32.mrf.mxu1 }
 0x108   : > { %v5603_v41 = vadd.f32 %v4309_v23, %v787_v0  ;;  %v782_v45 = vadd.f32 %v781_v3, %v5460_v35  ;;  %v4312_v31 = vpop.f32.mrf.mxu0  ;;  %4611 = vmatmul.mubr.msk.f32.gmra.mxu0 %vm310_vm1, %v5598_v27  ;;  %v5618_v35 = vld [vmem:[%s4754_s25 + $0x254] sm:$0xff] }
 0x109   : > { %v4262_v61 = vpop.f32.mrf.mxu1  ;;  %4561 = vmatmul.mubr.msk.f32.gmra.mxu1 %vm310_vm1, %v5414_v18  ;;  %4613 = vmatprep.mubr.msk.f32.mxu0 %vm310_vm1, %v5601_v10  ;;  %v5621_v18 = vld [vmem:[%s4754_s25 + $0x26c] sm:$0xff] }
 0x10a   : > { %v5610_v14 = vadd.f32 %v1047_v60, %v782_v45  ;;  %v797_v11 = vadd.f32 %v4262_v61, %v5468_v39  ;;  %4563 = vmatprep.mubr.msk.f32.mxu1 %vm310_vm1, %v5422_v22  ;;  %v1057_v9 = vpop.f32.mrf.mxu0 }
 0x10b   : > { %v791_v49 = vpop.f32.mrf.mxu1 }
 0x10c   : > { %v5623_v13 = vadd.f32 %v4312_v31, %v797_v11  ;;  %v792_v57 = vadd.f32 %v791_v49, %v5482_v43  ;;  %v4315_v39 = vpop.f32.mrf.mxu0  ;;  %4614 = vmatmul.mubr.msk.f32.gmra.mxu0 %vm310_vm1, %v5618_v35  ;;  %v5638_v43 = vld [vmem:[%s4754_s25 + $0x274] sm:$0xff] }
 0x10d   : > { %v4265_v15 = vpop.f32.mrf.mxu1  ;;  %4564 = vmatmul.mubr.msk.f32.gmra.mxu1 %vm310_vm1, %v5436_v26  ;;  %4616 = vmatprep.mubr.msk.f32.mxu0 %vm310_vm1, %v5621_v18  ;;  %v5641_v26 = vld [vmem:[%s4754_s25 + $0x28c] sm:$0xff] }
 0x10e   : > { %v5630_v22 = vadd.f32 %v1057_v9, %v792_v57  ;;  %v807_v17 = vadd.f32 %v4265_v15, %v5490_v47  ;;  %4566 = vmatprep.mubr.msk.f32.mxu1 %vm310_vm1, %v5444_v30  ;;  %v1067_v33 = vpop.f32.mrf.mxu0 }
 0x10f   : > { %v801_v25 = vpop.f32.mrf.mxu1 }
 0x110   : > { %v5643_v59 = vadd.f32 %v4315_v39, %v807_v17  ;;  %v802_v23 = vadd.f32 %v801_v25, %v5504_v51  ;;  %v4318_v47 = vpop.f32.mrf.mxu0  ;;  %4617 = vmatmul.mubr.msk.f32.gmra.mxu0 %vm310_vm1, %v5638_v43  ;;  %v5658_v51 = vld [vmem:[%s4754_s25 + $0x294] sm:$0xff] }
 0x111   : > { %v4268_v0 = vpop.f32.mrf.mxu1  ;;  %4567 = vmatmul.mubr.msk.f32.gmra.mxu1 %vm310_vm1, %v5458_v34  ;;  %4619 = vmatprep.mubr.msk.f32.mxu0 %vm310_vm1, %v5641_v26  ;;  %v5661_v34 = vld [vmem:[%s4754_s25 + $0x2ac] sm:$0xff] }
 0x112   : > { %v5650_v30 = vadd.f32 %v1067_v33, %v802_v23  ;;  %v817_v3 = vadd.f32 %v4268_v0, %v5508_v53  ;;  %4569 = vmatprep.mubr.msk.f32.mxu1 %vm310_vm1, %v5466_v38  ;;  %v1077_v45 = vpop.f32.mrf.mxu0  ;;  %v2253_v33 = vld [vmem:[%s4754_s25 + $0x2d4] sm:$0xff]  ;;  %v2254_v0 = vld [vmem:[%s4754_s25 + $0x2ec] sm:$0xff] }
 0x113   : > { %v811_v60 = vpop.f32.mrf.mxu1 }
 0x114   : > { %v5663_v61 = vadd.f32 %v4318_v47, %v817_v3  ;;  %v812_v31 = vadd.f32 %v811_v60, %v5519_v55  ;;  %v4321_v53 = vpop.f32.mrf.mxu0  ;;  %4620 = vmatmul.mubr.msk.f32.gmra.mxu0 %vm310_vm1, %v5658_v51  ;;  %v5678_v55 = vld [vmem:[%s4754_s25 + $0x2b4] sm:$0xff] }
 0x115   : > { %v4271_v11 = vpop.f32.mrf.mxu1  ;;  %4570 = vmatmul.mubr.msk.f32.gmra.mxu1 %vm310_vm1, %v5480_v42  ;;  %4622 = vmatprep.mubr.msk.f32.mxu0 %vm310_vm1, %v5661_v34  ;;  %v2252_v42 = vld [vmem:[%s4754_s25 + $0x2cc] sm:$0xff] }
 0x116   : > { %v5670_v38 = vadd.f32 %v1077_v45, %v812_v31  ;;  %v827_v49 = vadd.f32 %v4271_v11, %v5358_v1  ;;  %4572 = vmatprep.mubr.msk.f32.mxu1 %vm310_vm1, %v5488_v46  ;;  %v1087_v57 = vpop.f32.mrf.mxu0  ;;  %v2255_v45 = vld [vmem:[%s4754_s25 + $0x2f4] sm:$0xff]  ;;  %v2256_v11 = vld [vmem:[%s4754_s25 + $0x30c] sm:$0xff] }
 0x117   : > { %v821_v9 = vpop.f32.mrf.mxu1 }
 0x118   : > { %v5681_v15 = vadd.f32 %v4321_v53, %v827_v49  ;;  %v822_v39 = vadd.f32 %v821_v9, %v5373_v4  ;;  %v4324_v25 = vpop.f32.mrf.mxu0  ;;  %4623 = vmatmul.mubr.msk.f32.gmra.mxu0 %vm310_vm1, %v5678_v55 }
 0x119   : > { %v4274_v17 = vpop.f32.mrf.mxu1  ;;  %4573 = vmatmul.mubr.msk.f32.gmra.mxu1 %vm310_vm1, %v5502_v50  ;;  %4625 = vmatprep.mubr.msk.f32.mxu0 %vm310_vm1, %v2252_v42 }
 0x11a   : > { %v5688_v1 = vadd.f32 %v1087_v57, %v822_v39  ;;  %v837_v46 = vadd.f32 %v4274_v17, %v5381_v8  ;;  %4575 = vmatprep.mubr.msk.f32.mxu1 %vm310_vm1, %v5561_v5  ;;  %v1097_v23 = vpop.f32.mrf.mxu0  ;;  %v2257_v57 = vld [vmem:[%s4754_s25 + $0x314] sm:$0xff]  ;;  %v2258_v39 = vld [vmem:[%s4754_s25 + $0x32c] sm:$0xff] }
 0x11b   : > { %v831_v4 = vpop.f32.mrf.mxu1 }
 0x11c   : > { %v5696_v47 = vadd.f32 %v4324_v25, %v837_v46  ;;  %v832_v50 = vadd.f32 %v831_v4, %v5396_v12  ;;  %v4327_v60 = vpop.f32.mrf.mxu0  ;;  %4626 = vmatmul.mubr.msk.f32.gmra.mxu0 %vm310_vm1, %v2253_v33  ;;  %v2259_v33 = vld [vmem:[%s4754_s25 + $0x334] sm:$0xff] }
 0x11d   : > { %v4277_v3 = vpop.f32.mrf.mxu1  ;;  %4576 = vmatmul.mubr.msk.f32.gmra.mxu1 %vm310_vm1, %v5578_v19  ;;  %4628 = vmatprep.mubr.msk.f32.mxu0 %vm310_vm1, %v2254_v0 }
 0x11e   : > { %v5702_v8 = vadd.f32 %v1097_v23, %v832_v50  ;;  %v847_v5 = vadd.f32 %v4277_v3, %v5404_v16  ;;  %4578 = vmatprep.mubr.msk.f32.mxu1 %vm310_vm1, %v5581_v2  ;;  %v1107_v12 = vpop.f32.mrf.mxu0  ;;  %v2260_v23 = vld [vmem:[%s4754_s25 + $0x34c] sm:$0xff] }
 0x11f   : > { %v841_v31 = vpop.f32.mrf.mxu1 }
 0x120   : > { %v5710_v53 = vadd.f32 %v4327_v60, %v847_v5  ;;  %v842_v19 = vadd.f32 %v841_v31, %v5418_v20  ;;  %v4330_v9 = vpop.f32.mrf.mxu0  ;;  %4629 = vmatmul.mubr.msk.f32.gmra.mxu0 %vm310_vm1, %v2255_v45  ;;  %v2261_v60 = vld [vmem:[%s4754_s25 + $0x354] sm:$0xff]  ;;  %v2262_v45 = vld [vmem:[%s4754_s25 + $0x36c] sm:$0xff] }
 0x121   : > { %v4280_v49 = vpop.f32.mrf.mxu1  ;;  %4579 = vmatmul.mubr.msk.f32.gmra.mxu1 %vm310_vm1, %v5598_v27  ;;  %4631 = vmatprep.mubr.msk.f32.mxu0 %vm310_vm1, %v2256_v11 }
 0x122   : > { %v5716_v16 = vadd.f32 %v1107_v12, %v842_v19  ;;  %v857_v2 = vadd.f32 %v4280_v49, %v5426_v24  ;;  %4581 = vmatprep.mubr.msk.f32.mxu1 %vm310_vm1, %v5601_v10  ;;  %v1117_v20 = vpop.f32.mrf.mxu0  ;;  %v2263_v19 = vld [vmem:[%s4754_s25 + $0x374] sm:$0xff] }
 0x123   : > { %v851_v42 = vpop.f32.mrf.mxu1 }
 0x124   : > { %v5724_v17 = vadd.f32 %v4330_v9, %v857_v2  ;;  %v852_v27 = vadd.f32 %v851_v42, %v5440_v28  ;;  %v4333_v46 = vpop.f32.mrf.mxu0  ;;  %4632 = vmatmul.mubr.msk.f32.gmra.mxu0 %vm310_vm1, %v2257_v57 }
 0x125   : > { %v4283_v25 = vpop.f32.mrf.mxu1  ;;  %4582 = vmatmul.mubr.msk.f32.gmra.mxu1 %vm310_vm1, %v5618_v35  ;;  %4634 = vmatprep.mubr.msk.f32.mxu0 %vm310_vm1, %v2258_v39 }
 0x126   : > { %v5730_v24 = vadd.f32 %v1117_v20, %v852_v27  ;;  %v867_v10 = vadd.f32 %v4283_v25, %v5448_v32  ;;  %4584 = vmatprep.mubr.msk.f32.mxu1 %vm310_vm1, %v5621_v18  ;;  %v1127_v28 = vpop.f32.mrf.mxu0 }
 0x127   : > { %v861_v4 = vpop.f32.mrf.mxu1 }
 0x128   : > { %v5738_v0 = vadd.f32 %v4333_v46, %v867_v10  ;;  %v862_v35 = vadd.f32 %v861_v4, %v5462_v36  ;;  %v4336_v3 = vpop.f32.mrf.mxu0  ;;  %4635 = vmatmul.mubr.msk.f32.gmra.mxu0 %vm310_vm1, %v2259_v33 }
 0x129   : > { %v4286_v50 = vpop.f32.mrf.mxu1  ;;  %4585 = vmatmul.mubr.msk.f32.gmra.mxu1 %vm310_vm1, %v5638_v43  ;;  %4637 = vmatprep.mubr.msk.f32.mxu0 %vm310_vm1, %v2260_v23 }
 0x12a   : > { %v5744_v32 = vadd.f32 %v1127_v28, %v862_v35  ;;  %v877_v18 = vadd.f32 %v4286_v50, %v5470_v40  ;;  %4587 = vmatprep.mubr.msk.f32.mxu1 %vm310_vm1, %v5641_v26  ;;  %v1137_v36 = vpop.f32.mrf.mxu0 }
 0x12b   : > { %v871_v5 = vpop.f32.mrf.mxu1 }
 0x12c   : > { %v5752_v31 = vadd.f32 %v4336_v3, %v877_v18  ;;  %v872_v43 = vadd.f32 %v871_v5, %v5484_v44  ;;  %v4339_v11 = vpop.f32.mrf.mxu0  ;;  %4638 = vmatmul.mubr.msk.f32.gmra.mxu0 %vm310_vm1, %v2261_v60 }
 0x12d   : > { %v4289_v12 = vpop.f32.mrf.mxu1  ;;  %4588 = vmatmul.mubr.msk.f32.gmra.mxu1 %vm310_vm1, %v5658_v51  ;;  %4640 = vmatprep.mubr.msk.f32.mxu0 %vm310_vm1, %v2262_v45 }
 0x12e   : > { %v5758_v40 = vadd.f32 %v1137_v36, %v872_v43  ;;  %v887_v26 = vadd.f32 %v4289_v12, %v5492_v48  ;;  %4590 = vmatprep.mubr.msk.f32.mxu1 %vm310_vm1, %v5661_v34  ;;  %v1147_v9 = vpop.f32.mrf.mxu0 }
 0x12f   : > { %v881_v49 = vpop.f32.mrf.mxu1 }
 0x130   : > { %v5765_v44 = vadd.f32 %v4339_v11, %v887_v26  ;;  %v882_v2 = vadd.f32 %v881_v49, %v5506_v52  ;;  %v4342_v51 = vpop.f32.mrf.mxu0  ;;  %4641 = vmatmul.mubr.msk.f32.gmra.mxu0 %vm310_vm1, %v2263_v19 }
 0x131   : > { %v4292_v57 = vpop.f32.mrf.mxu1  ;;  %4591 = vmatmul.mubr.msk.f32.gmra.mxu1 %vm310_vm1, %v5678_v55 }
 0x132   : > { %v5771_v48 = vadd.f32 %v1147_v9, %v882_v2  ;;  %v897_v34 = vadd.f32 %v4292_v57, %v5510_v54  ;;  %v1157_v20 = vpop.f32.mrf.mxu0 }
 0x133   : > { %v891_v42 = vpop.f32.mrf.mxu1 }
 0x134   : > { %v5774_v39 = vadd.f32 %v4342_v51, %v897_v34  ;;  %v892_v27 = vadd.f32 %v891_v42, %v5521_v56  ;;  %v4397_v46 = vpop.f32.mrf.mxu0 }
 0x135   : > { %v4347_v25 = vpop.f32.mrf.mxu1 }
 0x136   : > { %v5777_v52 = vadd.f32 %v1157_v20, %v892_v27  ;;  %v1581_v10 = vadd.f32 %v4347_v25, %v5532_v21  ;;  %v1719_v55 = vpop.f32.mrf.mxu0 }
 0x137   : > { %v1421_v33 = vpop.f32.mrf.mxu1 }
 0x138   : > { %v5780_v4 = vadd.f32 %v4397_v46, %v1581_v10  ;;  %v1580_v28 = vadd.f32 %v1421_v33, %v5539_v58  ;;  %v4400_v54 = vpop.f32.mrf.mxu0 }
 0x139   : > { %v4350_v23 = vpop.f32.mrf.mxu1 }
 0x13a   : > { %v5783_v35 = vadd.f32 %v1719_v55, %v1580_v28  ;;  %v1583_v50 = vadd.f32 %v4350_v23, %v5546_v37  ;;  %v1729_v56 = vpop.f32.mrf.mxu0 }
 0x13b   : > { %v1431_v3 = vpop.f32.mrf.mxu1 }
 0x13c   : > { %v5786_v18 = vadd.f32 %v4400_v54, %v1583_v50  ;;  %v1582_v60 = vadd.f32 %v1431_v3, %v5553_v7  ;;  %v4403_v21 = vpop.f32.mrf.mxu0 }
 0x13d   : > { %v4353_v5 = vpop.f32.mrf.mxu1 }
 0x13e   : > { %v5789_v36 = vadd.f32 %v1729_v56, %v1582_v60  ;;  %v1585_v45 = vadd.f32 %v4353_v5, %v5563_v62  ;;  %v1739_v58 = vpop.f32.mrf.mxu0 }
 0x13f   : > { %v1441_v43 = vpop.f32.mrf.mxu1 }
 0x140   : > { %v5792_v12 = vadd.f32 %v4403_v21, %v1585_v45  ;;  %v1584_v11 = vadd.f32 %v1441_v43, %v5570_v63  ;;  %v4406_v37 = vpop.f32.mrf.mxu0 }
 0x141   : > { %v4356_v26 = vpop.f32.mrf.mxu1 }
 0x142   : > { %v5795_v19 = vadd.f32 %v1739_v58, %v1584_v11  ;;  %v1587_v49 = vadd.f32 %v4356_v26, %v5583_v29  ;;  %v1749_v7 = vpop.f32.mrf.mxu0 }
 0x143   : > { %v1451_v9 = vpop.f32.mrf.mxu1 }
 0x144   : > { %v5798_v2 = vadd.f32 %v4406_v37, %v1587_v49  ;;  %v1586_v57 = vadd.f32 %v1451_v9, %v5590_v6  ;;  %v4409_v62 = vpop.f32.mrf.mxu0 }
 0x145   : > { %v4359_v51 = vpop.f32.mrf.mxu1 }
 0x146   : > { %v5801_v34 = vadd.f32 %v1749_v7, %v1586_v57  ;;  %v1589_v42 = vadd.f32 %v4359_v51, %v5603_v41  ;;  %v1759_v63 = vpop.f32.mrf.mxu0 }
 0x147   : > { %v1461_v20 = vpop.f32.mrf.mxu1 }
 0x148   : > { %v5804_v27 = vadd.f32 %v4409_v62, %v1589_v42  ;;  %v1588_v25 = vadd.f32 %v1461_v20, %v5610_v14  ;;  %v4412_v29 = vpop.f32.mrf.mxu0 }
 0x149   : > { %v4362_v46 = vpop.f32.mrf.mxu1 }
 0x14a   : > { %v5807_v10 = vadd.f32 %v1759_v63, %v1588_v25  ;;  %v1591_v33 = vadd.f32 %v4362_v46, %v5623_v13  ;;  %v1769_v6 = vpop.f32.mrf.mxu0 }
 0x14b   : > { %v1471_v55 = vpop.f32.mrf.mxu1 }
 0x14c   : > { %v5810_v28 = vadd.f32 %v4412_v29, %v1591_v33  ;;  %v1590_v23 = vadd.f32 %v1471_v55, %v5630_v22  ;;  %v4415_v41 = vpop.f32.mrf.mxu0 }
 0x14d   : > { %v4365_v54 = vpop.f32.mrf.mxu1 }
 0x14e   : > { %v5813_v50 = vadd.f32 %v1769_v6, %v1590_v23  ;;  %v1593_v3 = vadd.f32 %v4365_v54, %v5643_v59  ;;  %v1779_v14 = vpop.f32.mrf.mxu0 }
 0x14f   : > { %v1481_v56 = vpop.f32.mrf.mxu1 }
 0x150   : > { %v5816_v60 = vadd.f32 %v4415_v41, %v1593_v3  ;;  %v1592_v5 = vadd.f32 %v1481_v56, %v5650_v30  ;;  %v4418_v13 = vpop.f32.mrf.mxu0 }
 0x151   : > { %v4368_v21 = vpop.f32.mrf.mxu1 }
 0x152   : > { %v5819_v45 = vadd.f32 %v1779_v14, %v1592_v5  ;;  %v1595_v43 = vadd.f32 %v4368_v21, %v5663_v61  ;;  %v1789_v22 = vpop.f32.mrf.mxu0 }
 0x153   : > { %v1491_v58 = vpop.f32.mrf.mxu1 }
 0x154   : > { %v5822_v11 = vadd.f32 %v4418_v13, %v1595_v43  ;;  %v1594_v26 = vadd.f32 %v1491_v58, %v5670_v38  ;;  %v4421_v59 = vpop.f32.mrf.mxu0 }
 0x155   : > { %v4371_v37 = vpop.f32.mrf.mxu1 }
 0x156   : > { %v5825_v49 = vadd.f32 %v1789_v22, %v1594_v26  ;;  %v1597_v9 = vadd.f32 %v4371_v37, %v5681_v15  ;;  %v1799_v30 = vpop.f32.mrf.mxu0 }
 0x157   : > { %v1501_v7 = vpop.f32.mrf.mxu1 }
 0x158   : > { %v5828_v57 = vadd.f32 %v4421_v59, %v1597_v9  ;;  %v1596_v51 = vadd.f32 %v1501_v7, %v5688_v1  ;;  %v4424_v61 = vpop.f32.mrf.mxu0 }
 0x159   : > { %v4374_v62 = vpop.f32.mrf.mxu1 }
 0x15a   : > { %v5831_v42 = vadd.f32 %v1799_v30, %v1596_v51  ;;  %v1599_v20 = vadd.f32 %v4374_v62, %v5696_v47  ;;  %v1809_v38 = vpop.f32.mrf.mxu0 }
 0x15b   : > { %v1511_v63 = vpop.f32.mrf.mxu1 }
 0x15c   : > { %v5834_v25 = vadd.f32 %v4424_v61, %v1599_v20  ;;  %v1598_v46 = vadd.f32 %v1511_v63, %v5702_v8  ;;  %v4427_v15 = vpop.f32.mrf.mxu0 }
 0x15d   : > { %v4377_v29 = vpop.f32.mrf.mxu1 }
 0x15e   : > { %6181 = vst [vmem:[#allocation2_spill] sm:$0xff] %v5834_v25  ;;  %v5837_v33 = vadd.f32 %v1809_v38, %v1598_v46  ;;  %v1601_v55 = vadd.f32 %v4377_v29, %v5710_v53  ;;  %v1819_v1 = vpop.f32.mrf.mxu0 }
 0x15f   : > { %v1521_v6 = vpop.f32.mrf.mxu1 }
 0x160   : > { %6182 = vst [vmem:[#allocation3_spill] sm:$0xff] %v5837_v33  ;;  %v5840_v23 = vadd.f32 %v4427_v15, %v1601_v55  ;;  %v1600_v54 = vadd.f32 %v1521_v6, %v5716_v16  ;;  %v4430_v47 = vpop.f32.mrf.mxu0 }
 0x161   : > { %v4380_v41 = vpop.f32.mrf.mxu1 }
 0x162   : > { %6183 = vst [vmem:[#allocation4_spill] sm:$0xff] %v5840_v23  ;;  %v5843_v3 = vadd.f32 %v1819_v1, %v1600_v54  ;;  %v1603_v56 = vadd.f32 %v4380_v41, %v5724_v17  ;;  %v1829_v8 = vpop.f32.mrf.mxu0 }
 0x163   : > { %v1531_v14 = vpop.f32.mrf.mxu1 }
 0x164   : > { %6184 = vst [vmem:[#allocation5_spill] sm:$0xff] %v5843_v3  ;;  %v5846_v5 = vadd.f32 %v4430_v47, %v1603_v56  ;;  %v1602_v21 = vadd.f32 %v1531_v14, %v5730_v24  ;;  %v4433_v53 = vpop.f32.mrf.mxu0 }
 0x165   : > { %v4383_v13 = vpop.f32.mrf.mxu1 }
 0x166   : > { %6185 = vst [vmem:[#allocation6_spill] sm:$0xff] %v5846_v5  ;;  %v5849_v43 = vadd.f32 %v1829_v8, %v1602_v21  ;;  %v1605_v58 = vadd.f32 %v4383_v13, %v5738_v0  ;;  %v1839_v16 = vpop.f32.mrf.mxu0 }
 0x167   : > { %v1541_v22 = vpop.f32.mrf.mxu1 }
 0x168   : > { %6186 = vst [vmem:[#allocation7_spill] sm:$0xff] %v5849_v43  ;;  %v5852_v26 = vadd.f32 %v4433_v53, %v1605_v58  ;;  %v1604_v37 = vadd.f32 %v1541_v22, %v5744_v32  ;;  %v4436_v17 = vpop.f32.mrf.mxu0 }
 0x169   : > { %v4386_v59 = vpop.f32.mrf.mxu1 }
 0x16a   : > { %6187 = vst [vmem:[#allocation8_spill] sm:$0xff] %v5852_v26  ;;  %v5855_v9 = vadd.f32 %v1839_v16, %v1604_v37  ;;  %v1607_v7 = vadd.f32 %v4386_v59, %v5752_v31  ;;  %v1849_v24 = vpop.f32.mrf.mxu0 }
 0x16b   : > { %v1551_v30 = vpop.f32.mrf.mxu1 }
 0x16c   : > { %6188 = vst [vmem:[#allocation9_spill] sm:$0xff] %v5855_v9  ;;  %v5858_v51 = vadd.f32 %v4436_v17, %v1607_v7  ;;  %v1606_v62 = vadd.f32 %v1551_v30, %v5758_v40  ;;  %v4439_v0 = vpop.f32.mrf.mxu0 }
 0x16d   : > { %v4389_v61 = vpop.f32.mrf.mxu1 }
 0x16e   : > { %6189 = vst [vmem:[#allocation10_spill] sm:$0xff] %v5858_v51  ;;  %v5861_v20 = vadd.f32 %v1849_v24, %v1606_v62  ;;  %v1609_v63 = vadd.f32 %v4389_v61, %v5765_v44  ;;  %v1859_v32 = vpop.f32.mrf.mxu0 }
 0x16f   : > { %v1561_v38 = vpop.f32.mrf.mxu1 }
 0x170   : > { %6190 = vst [vmem:[#allocation11_spill] sm:$0xff] %v5861_v20  ;;  %v5864_v46 = vadd.f32 %v4439_v0, %v1609_v63  ;;  %v1608_v29 = vadd.f32 %v1561_v38, %v5771_v48  ;;  %v4442_v31 = vpop.f32.mrf.mxu0 }
 0x171   : > { %v4392_v15 = vpop.f32.mrf.mxu1 }
 0x172   : > { %6191 = vst [vmem:[#allocation12_spill] sm:$0xff] %v5864_v46  ;;  %v5867_v55 = vadd.f32 %v1859_v32, %v1608_v29  ;;  %v1611_v6 = vadd.f32 %v4392_v15, %v5774_v39  ;;  %v1869_v40 = vpop.f32.mrf.mxu0 }
 0x173   : > { %v1571_v1 = vpop.f32.mrf.mxu1 }
 0x174   : > { %6192 = vst [vmem:[#allocation13_spill] sm:$0xff] %v5867_v55  ;;  %v5870_v54 = vadd.f32 %v4442_v31, %v1611_v6  ;;  %v1610_v41 = vadd.f32 %v1571_v1, %v5777_v52  ;;  %v5873_v44 = vpop.f32.mrf.mxu0 }
 0x175   : > { %v4447_v47 = vpop.f32.mrf.mxu1 }
 0x176   : > { %6193 = vst [vmem:[#allocation14_spill] sm:$0xff] %v5870_v54  ;;  %v5875_v56 = vadd.f32 %v1869_v40, %v1610_v41  ;;  %v5877_v8 = vpop.f32.mrf.mxu0 }
 0x177   : > { %v2017_v14 = vpop.f32.mrf.mxu1 }
 0x178   : > { %6194 = vst [vmem:[#allocation15_spill] sm:$0xff] %v5875_v56  ;;  %v5881_v21 = vpop.f32.mrf.mxu0 }
 0x179   : > { %v5879_v48 = vpop.f32.mrf.mxu1 }
 0x17a   : > { %v5885_v39 = vpop.f32.mrf.mxu0 }
 0x17b   : > { %v5883_v13 = vpop.f32.mrf.mxu1 }
 0x17c   : > { %v5889_v58 = vpop.f32.mrf.mxu0 }
 0x17d   : > { %v5887_v53 = vpop.f32.mrf.mxu1 }
 0x17e   : > { %v5893_v22 = vpop.f32.mrf.mxu0 }
 0x17f   : > { %v5891_v52 = vpop.f32.mrf.mxu1 }
 0x180   : > { %v5897_v37 = vpop.f32.mrf.mxu0 }
 0x181   : > { %v5895_v16 = vpop.f32.mrf.mxu1 }
 0x182   : > { %v5901_v17 = vpop.f32.mrf.mxu0 }
 0x183   : > { %v5899_v59 = vpop.f32.mrf.mxu1 }
 0x184   : > { %v5905_v30 = vpop.f32.mrf.mxu0 }
 0x185   : > { %v5903_v7 = vpop.f32.mrf.mxu1 }
 0x186   : > { %v5909_v62 = vpop.f32.mrf.mxu0 }
 0x187   : > { %v5907_v24 = vpop.f32.mrf.mxu1 }
 0x188   : > { %v5913_v0 = vpop.f32.mrf.mxu0 }
 0x189   : > { %v5911_v61 = vpop.f32.mrf.mxu1 }
 0x18a   : > { %v5917_v38 = vpop.f32.mrf.mxu0 }
 0x18b   : > { %v5915_v63 = vpop.f32.mrf.mxu1 }
 0x18c   : > { %v5921_v29 = vpop.f32.mrf.mxu0 }
 0x18d   : > { %v5919_v32 = vpop.f32.mrf.mxu1 }
 0x18e   : > { %v5925_v31 = vpop.f32.mrf.mxu0 }
 0x18f   : > { %v5923_v15 = vpop.f32.mrf.mxu1 }
 0x190   : > { %v5929_v1 = vpop.f32.mrf.mxu0 }
 0x191   : > { %v5927_v6 = vpop.f32.mrf.mxu1 }
 0x192   : > { %v5933_v41 = vpop.f32.mrf.mxu0 }
 0x193   : > { %v5931_v40 = vpop.f32.mrf.mxu1 }
 0x194   : > { %v5937_v54 = vpop.f32.mrf.mxu0 }
 0x195   : > { %v5935_v56 = vpop.f32.mrf.mxu1 }
 0x196   : > { %v5941_v46 = vpop.f32.mrf.mxu0 }
 0x197   : > { %v5939_v55 = vpop.f32.mrf.mxu1  ;;  %6195 = vst [vmem:[#allocation16_spill] sm:$0xff] %v5941_v46 }
 0x198   : > { %v5945_v51 = vpop.f32.mrf.mxu0 }
 0x199   : > { %v5943_v20 = vpop.f32.mrf.mxu1  ;;  %6197 = vst [vmem:[#allocation18_spill] sm:$0xff] %v5945_v51 }
 0x19a   : > { %6196 = vst [vmem:[#allocation17_spill] sm:$0xff] %v5943_v20  ;;  %v5949_v26 = vpop.f32.mrf.mxu0 }
 0x19b   : > { %v5947_v9 = vpop.f32.mrf.mxu1  ;;  %6199 = vst [vmem:[#allocation20_spill] sm:$0xff] %v5949_v26 }
 0x19c   : > { %6198 = vst [vmem:[#allocation19_spill] sm:$0xff] %v5947_v9  ;;  %v5953_v5 = vpop.f32.mrf.mxu0 }
 0x19d   : > { %v5951_v43 = vpop.f32.mrf.mxu1  ;;  %6201 = vst [vmem:[#allocation22_spill] sm:$0xff] %v5953_v5 }
 0x19e   : > { %6200 = vst [vmem:[#allocation21_spill] sm:$0xff] %v5951_v43  ;;  %v5957_v23 = vpop.f32.mrf.mxu0 }
 0x19f   : > { %v5955_v3 = vpop.f32.mrf.mxu1  ;;  %6203 = vst [vmem:[#allocation24_spill] sm:$0xff] %v5957_v23 }
 0x1a0   : > { %6202 = vst [vmem:[#allocation23_spill] sm:$0xff] %v5955_v3  ;;  %v5961_v25 = vpop.f32.mrf.mxu0 }
 0x1a1   : > { %v5959_v33 = vpop.f32.mrf.mxu1  ;;  %6205 = vst [vmem:[#allocation26_spill] sm:$0xff] %v5961_v25 }
 0x1a2   : > { %6204 = vst [vmem:[#allocation25_spill] sm:$0xff] %v5959_v33  ;;  %v5965_v20 = vpop.f32.mrf.mxu0 }
 0x1a3   : > { %v5963_v46 = vpop.f32.mrf.mxu1  ;;  %6207 = vst [vmem:[#allocation28_spill] sm:$0xff] %v5965_v20 }
 0x1a4   : > { %6206 = vst [vmem:[#allocation27_spill] sm:$0xff] %v5963_v46  ;;  %v5969_v9 = vpop.f32.mrf.mxu0 }
 0x1a5   : > { %v5967_v51 = vpop.f32.mrf.mxu1  ;;  %6209 = vst [vmem:[#allocation30_spill] sm:$0xff] %v5969_v9  ;;  %v2177_v9 = vadd.f32 %v4447_v47, %v5780_v4  ;;  %v2178_v47 = vadd.f32 %v5883_v13, %v5789_v36  ;;  %v2182_v13 = vadd.f32 %v5899_v59, %v5801_v34 }
 0x1a6   : > { %6208 = vst [vmem:[#allocation29_spill] sm:$0xff] %v5967_v51  ;;  %v5973_v43 = vpop.f32.mrf.mxu0 }
 0x1a7   : > { %v5971_v26 = vpop.f32.mrf.mxu1  ;;  %6211 = vst [vmem:[#allocation32_spill] sm:$0xff] %v5973_v43 }
 0x1a8   : > { %6210 = vst [vmem:[#allocation31_spill] sm:$0xff] %v5971_v26  ;;  %v5977_v3 = vpop.f32.mrf.mxu0 }
 0x1a9   : > { %v5975_v5 = vpop.f32.mrf.mxu1  ;;  %6213 = vst [vmem:[#allocation34_spill] sm:$0xff] %v5977_v3  ;;  %v2176_v3 = vadd.f32 %v2017_v14, %v5783_v35 }
 0x1aa   : > { %6212 = vst [vmem:[#allocation33_spill] sm:$0xff] %v5975_v5  ;;  %v5981_v33 = vpop.f32.mrf.mxu0 }
 0x1ab   : > { %v5979_v23 = vpop.f32.mrf.mxu1  ;;  %6215 = vst [vmem:[#allocation36_spill] sm:$0xff] %v5981_v33  ;;  %v2591_v33 = vadd.f32 %v5873_v44, %v2177_v9  ;;  %v2590_v4 = vadd.f32 %v5877_v8, %v2176_v3  ;;  %v2181_v9 = vadd.f32 %v5887_v53, %v5792_v12  ;;  %v6015_v3 = vld [vmem:[%s6179_s2] ss:$0 sm:$0xff] }
 0x1ac   : > { %6214 = vst [vmem:[#allocation35_spill] sm:$0xff] %v5979_v23  ;;  %v5985_v46 = vpop.f32.mrf.mxu0 }
 0x1ad   : > { %v5983_v25 = vpop.f32.mrf.mxu1  ;;  %6216 = vst [vmem:[#allocation37_spill] sm:$0xff] %v5985_v46  ;;  %v2179_v46 = vadd.f32 %v5879_v48, %v5786_v18  ;;  %v2180_v18 = vadd.f32 %v5891_v52, %v5795_v19  ;;  %v2595_v48 = vadd.f32 %v5889_v58, %v2181_v9  ;;  %v2185_v52 = vadd.f32 %v5903_v7, %v5804_v27 }
 0x1ae   : > { %v5989_v51 = vpop.f32.mrf.mxu0 }
 0x1af   : > { %v5987_v20 = vpop.f32.mrf.mxu1  ;;  %6218 = vst [vmem:[#allocation39_spill] sm:$0xff] %v5989_v51  ;;  %v2593_v14 = vadd.f32 %v5881_v21, %v2179_v46  ;;  %v2594_v21 = vadd.f32 %v5893_v22, %v2180_v18 }
 0x1b0   : > { %6217 = vst [vmem:[#allocation38_spill] sm:$0xff] %v5987_v20  ;;  %v5994_v43 = vpop.f32.mrf.mxu0 }
 0x1b1   : > { %v5992_v26 = vpop.f32.mrf.mxu1  ;;  %6220 = vst [vmem:[#allocation41_spill] sm:$0xff] %v5994_v43 }
 0x1b2   : > { %6219 = vst [vmem:[#allocation40_spill] sm:$0xff] %v5992_v26  ;;  %v5999_v23 = vpop.f32.mrf.mxu0 }
 0x1b3   : > { %v5997_v5 = vpop.f32.mrf.mxu1  ;;  %6222 = vst [vmem:[#allocation43_spill] sm:$0xff] %v5999_v23 }
 0x1b4   : > { %6221 = vst [vmem:[#allocation42_spill] sm:$0xff] %v5997_v5  ;;  %v4597_v51 = vpop.f32.mrf.mxu0 }
 0x1b5   : > { %v4547_v20 = vpop.f32.mrf.mxu1 }
 0x1b6   : > { %v2889_v43 = vadd.f32 %v4547_v20, %v2591_v33  ;;  %v3027_v35 = vpop.f32.mrf.mxu0  ;;  %v2592_v33 = vadd.f32 %v5885_v39, %v2178_v47 }
 0x1b7   : > { %v2729_v26 = vpop.f32.mrf.mxu1 }
 0x1b8   : > { %v3187_v5 = vadd.f32 %v4597_v51, %v2889_v43  ;;  %v2888_v23 = vadd.f32 %v2729_v26, %v2590_v4  ;;  %v4600_v36 = vpop.f32.mrf.mxu0  ;;  %v2183_v43 = vadd.f32 %v5895_v16, %v5798_v2 }
 0x1b9   : > { %v4550_v44 = vpop.f32.mrf.mxu1 }
 0x1ba   : > { %v3186_v20 = vadd.f32 %v3027_v35, %v2888_v23  ;;  %v2891_v46 = vadd.f32 %v4550_v44, %v2593_v14  ;;  %v3037_v12 = vpop.f32.mrf.mxu0  ;;  %v3365_v51 = vadd.f32 %v6015_v3, %v3187_v5  ;;  %v2597_v58 = vadd.f32 %v5897_v37, %v2183_v43 }
 0x1bb   : > { %v2739_v26 = vpop.f32.mrf.mxu1  ;;  %v2596_v35 = vadd.f32 %v5901_v17, %v2182_v13 }
 0x1bc   : > { %v3189_v19 = vadd.f32 %v4600_v36, %v2891_v46  ;;  %v2890_v8 = vadd.f32 %v2739_v26, %v2592_v33  ;;  %v4603_v23 = vpop.f32.mrf.mxu0  ;;  %v3397_v39 = vmax.f32 %v3365_v51, 0.0  ;;  %v3364_v5 = vadd.f32 %v6015_v3, %v3186_v20 }
 0x1bd   : > { %v4553_v2 = vpop.f32.mrf.mxu1  ;;  %v2599_v36 = vadd.f32 %v5905_v30, %v2185_v52  ;;  %v2184_v33 = vadd.f32 %v5907_v24, %v5807_v10  ;;  %v2187_v20 = vadd.f32 %v5911_v61, %v5810_v28  ;;  %v2186_v51 = vadd.f32 %v5915_v63, %v5813_v50 }
 0x1be   : > { %v3188_v53 = vadd.f32 %v3037_v12, %v2890_v8  ;;  %v2893_v22 = vadd.f32 %v4553_v2, %v2595_v48  ;;  %v3047_v16 = vpop.f32.mrf.mxu0  ;;  %3429 = vst [vmem:[%s6029_s19 + $0x8] sm:$0xff] %v3397_v39  ;;  %v3396_v59 = vmax.f32 %v3364_v5, 0.0  ;;  %v3367_v4 = vadd.f32 %v6015_v3, %v3189_v19 }
 0x1bf   : > { %v2749_v34 = vpop.f32.mrf.mxu1  ;;  %v2598_v28 = vadd.f32 %v5909_v62, %v2184_v33  ;;  %v2601_v61 = vadd.f32 %v5913_v0, %v2187_v20  ;;  %v2600_v5 = vadd.f32 %v5917_v38, %v2186_v51  ;;  %v2192_v20 = vadd.f32 %v5939_v55, %v5831_v42  ;;  %v6223_v51 = vld [vmem:[#allocation2_spill] sm:$0xff] }
 0x1c0   : > { %v2892_v47 = vadd.f32 %v2749_v34, %v2594_v21  ;;  %v3191_v14 = vadd.f32 %v4603_v23, %v2893_v22  ;;  %v4606_v18 = vpop.f32.mrf.mxu0  ;;  %3428 = vst [vmem:[%s6029_s19] sm:$0xff] %v3396_v59  ;;  %v3399_v44 = vmax.f32 %v3367_v4, 0.0  ;;  %v3366_v37 = vadd.f32 %v6015_v3, %v3188_v53 }
 0x1c1   : > { %v4556_v9 = vpop.f32.mrf.mxu1  ;;  %v2189_v21 = vadd.f32 %v5919_v32, %v5816_v60  ;;  %v2188_v53 = vadd.f32 %v5923_v15, %v5819_v45 }
 0x1c2   : > { %v3190_v27 = vadd.f32 %v3047_v16, %v2892_v47  ;;  %v2895_v7 = vadd.f32 %v4556_v9, %v2597_v58  ;;  %v3057_v17 = vpop.f32.mrf.mxu0  ;;  %3431 = vst [vmem:[%s6029_s19 + $0x18] sm:$0xff] %v3399_v44  ;;  %v3398_v43 = vmax.f32 %v3366_v37, 0.0  ;;  %v3369_v19 = vadd.f32 %v6015_v3, %v3191_v14 }
 0x1c3   : > { %v2759_v46 = vpop.f32.mrf.mxu1  ;;  %v2603_v22 = vadd.f32 %v5921_v29, %v2189_v21  ;;  %v2602_v47 = vadd.f32 %v5925_v31, %v2188_v53  ;;  %v2190_v14 = vadd.f32 %v5931_v40, %v5825_v49 }
 0x1c4   : > { %v3193_v26 = vadd.f32 %v4606_v18, %v2895_v7  ;;  %v2894_v12 = vadd.f32 %v2759_v46, %v2596_v35  ;;  %v4609_v48 = vpop.f32.mrf.mxu0  ;;  %3430 = vst [vmem:[%s6029_s19 + $0x10] sm:$0xff] %v3398_v43  ;;  %v3368_v10 = vadd.f32 %v6015_v3, %v3190_v27  ;;  %v3401_v13 = vmax.f32 %v3369_v19, 0.0  ;;  %v6224_v19 = vld [vmem:[#allocation17_spill] sm:$0xff] }
 0x1c5   : > { %v4559_v8 = vpop.f32.mrf.mxu1  ;;  %v2191_v35 = vadd.f32 %v5927_v6, %v5822_v11  ;;  %v2193_v27 = vadd.f32 %v5935_v56, %v5828_v57  ;;  %v2604_v40 = vadd.f32 %v5933_v41, %v2190_v14 }
 0x1c6   : > { %v3192_v30 = vadd.f32 %v3057_v17, %v2894_v12  ;;  %v2897_v24 = vadd.f32 %v4559_v8, %v2599_v36  ;;  %v3067_v63 = vpop.f32.mrf.mxu0  ;;  %v3400_v2 = vmax.f32 %v3368_v10, 0.0  ;;  %v3371_v23 = vadd.f32 %v6015_v3, %v3193_v26  ;;  %3433 = vst [vmem:[%s6029_s19 + $0x28] sm:$0xff] %v3401_v13 }
 0x1c7   : > { %v2769_v50 = vpop.f32.mrf.mxu1  ;;  %v2605_v49 = vadd.f32 %v5929_v1, %v2191_v35  ;;  %v2607_v12 = vadd.f32 %v5937_v54, %v2193_v27  ;;  %v2195_v8 = vadd.f32 %v6224_v19, %v6223_v51  ;;  %v6236_v27 = vld [vmem:[#allocation25_spill] sm:$0xff] }
 0x1c8   : > { %v3195_v39 = vadd.f32 %v4609_v48, %v2897_v24  ;;  %v2896_v62 = vadd.f32 %v2769_v50, %v2598_v28  ;;  %v4612_v0 = vpop.f32.mrf.mxu0  ;;  %3432 = vst [vmem:[%s6029_s19 + $0x20] sm:$0xff] %v3400_v2  ;;  %v3403_v52 = vmax.f32 %v3371_v23, 0.0  ;;  %v3370_v60 = vadd.f32 %v6015_v3, %v3192_v30  ;;  %v6225_v30 = vld [vmem:[#allocation16_spill] sm:$0xff]  ;;  %v6226_v2 = vld [vmem:[#allocation18_spill] sm:$0xff] }
 0x1c9   : > { %v4562_v58 = vpop.f32.mrf.mxu1  ;;  %v2606_v24 = vadd.f32 %v6225_v30, %v2192_v20  ;;  %v2609_v23 = vadd.f32 %v6226_v2, %v2195_v8  ;;  %v6240_v8 = vld [vmem:[#allocation26_spill] sm:$0xff] }
 0x1ca   : > { %v2899_v32 = vadd.f32 %v4562_v58, %v2601_v61  ;;  %v3194_v34 = vadd.f32 %v3067_v63, %v2896_v62  ;;  %v3077_v59 = vpop.f32.mrf.mxu0  ;;  %3435 = vst [vmem:[%s6029_s19 + $0x38] sm:$0xff] %v3403_v52  ;;  %v3402_v38 = vmax.f32 %v3370_v60, 0.0  ;;  %v3373_v4 = vadd.f32 %v6015_v3, %v3195_v39  ;;  %v6227_v39 = vld [vmem:[#allocation3_spill] sm:$0xff]  ;;  %v6229_v62 = vld [vmem:[#allocation4_spill] sm:$0xff]  ;;  %v6230_v58 = vld [vmem:[#allocation21_spill] sm:$0xff] }
 0x1cb   : > { %v2779_v16 = vpop.f32.mrf.mxu1 }
 0x1cc   : > { %v3197_v45 = vadd.f32 %v4612_v0, %v2899_v32  ;;  %v2898_v15 = vadd.f32 %v2779_v16, %v2600_v5  ;;  %v4615_v29 = vpop.f32.mrf.mxu0  ;;  %3434 = vst [vmem:[%s6029_s19 + $0x30] sm:$0xff] %v3402_v38  ;;  %v3405_v18 = vmax.f32 %v3373_v4, 0.0  ;;  %v3372_v7 = vadd.f32 %v6015_v3, %v3194_v34  ;;  %v6228_v5 = vld [vmem:[#allocation19_spill] sm:$0xff]  ;;  %v6231_v16 = vld [vmem:[#allocation5_spill] sm:$0xff] }
 0x1cd   : > { %v4565_v9 = vpop.f32.mrf.mxu1  ;;  %v2194_v53 = vadd.f32 %v6228_v5, %v6227_v39  ;;  %v2197_v0 = vadd.f32 %v6230_v58, %v6229_v62  ;;  %v6246_v58 = vld [vmem:[#allocation10_spill] sm:$0xff] }
 0x1ce   : > { %v3196_v44 = vadd.f32 %v3077_v59, %v2898_v15  ;;  %v2901_v37 = vadd.f32 %v4565_v9, %v2603_v22  ;;  %v3087_v33 = vpop.f32.mrf.mxu0  ;;  %3437 = vst [vmem:[%s6029_s19 + $0x48] sm:$0xff] %v3405_v18  ;;  %v3375_v11 = vadd.f32 %v6015_v3, %v3197_v45  ;;  %v3404_v46 = vmax.f32 %v3372_v7, 0.0  ;;  %v6232_v59 = vld [vmem:[#allocation23_spill] sm:$0xff]  ;;  %v6233_v9 = vld [vmem:[#allocation20_spill] sm:$0xff]  ;;  %v6234_v18 = vld [vmem:[#allocation22_spill] sm:$0xff] }
 0x1cf   : > { %v2789_v36 = vpop.f32.mrf.mxu1  ;;  %v2196_v38 = vadd.f32 %v6232_v59, %v6231_v16 }
 0x1d0   : > { %v3199_v31 = vadd.f32 %v4615_v29, %v2901_v37  ;;  %v2900_v6 = vadd.f32 %v2789_v36, %v2602_v47  ;;  %v4618_v56 = vpop.f32.mrf.mxu0  ;;  %v3407_v17 = vmax.f32 %v3375_v11, 0.0  ;;  %v3374_v43 = vadd.f32 %v6015_v3, %v3196_v44  ;;  %3436 = vst [vmem:[%s6029_s19 + $0x40] sm:$0xff] %v3404_v46  ;;  %v6235_v37 = vld [vmem:[#allocation6_spill] sm:$0xff]  ;;  %v6238_v46 = vld [vmem:[#allocation7_spill] sm:$0xff] }
 0x1d1   : > { %v4568_v57 = vpop.f32.mrf.mxu1  ;;  %v2608_v29 = vadd.f32 %v6233_v9, %v2194_v53  ;;  %v2611_v44 = vadd.f32 %v6234_v18, %v2197_v0  ;;  %v2199_v7 = vadd.f32 %v6236_v27, %v6235_v37  ;;  %v6247_v0 = vld [vmem:[#allocation33_spill] sm:$0xff] }
 0x1d2   : > { %v3198_v26 = vadd.f32 %v3087_v33, %v2900_v6  ;;  %v2903_v1 = vadd.f32 %v4568_v57, %v2605_v49  ;;  %v3097_v41 = vpop.f32.mrf.mxu0  ;;  %3439 = vst [vmem:[%s6029_s19 + $0x58] sm:$0xff] %v3407_v17  ;;  %v3406_v10 = vmax.f32 %v3374_v43, 0.0  ;;  %v3377_v42 = vadd.f32 %v6015_v3, %v3199_v31  ;;  %v6239_v57 = vld [vmem:[#allocation27_spill] sm:$0xff] }
 0x1d3   : > { %v2799_v48 = vpop.f32.mrf.mxu1 }
 0x1d4   : > { %v2902_v55 = vadd.f32 %v2799_v48, %v2604_v40  ;;  %v3201_v28 = vadd.f32 %v4618_v56, %v2903_v1  ;;  %v4621_v21 = vpop.f32.mrf.mxu0  ;;  %3438 = vst [vmem:[%s6029_s19 + $0x50] sm:$0xff] %v3406_v10  ;;  %v3409_v54 = vmax.f32 %v3377_v42, 0.0  ;;  %v3376_v13 = vadd.f32 %v6015_v3, %v3198_v26  ;;  %v6237_v40 = vld [vmem:[#allocation24_spill] sm:$0xff] }
 0x1d5   : > { %v4571_v61 = vpop.f32.mrf.mxu1  ;;  %v2610_v20 = vadd.f32 %v6237_v40, %v2196_v38  ;;  %v2198_v56 = vadd.f32 %v6239_v57, %v6238_v46  ;;  %v2613_v1 = vadd.f32 %v6240_v8, %v2199_v7  ;;  %v6248_v38 = vld [vmem:[#allocation30_spill] sm:$0xff]  ;;  %v6254_v57 = vld [vmem:[#allocation36_spill] sm:$0xff]  ;;  %v6255_v8 = vld [vmem:[#allocation37_spill] sm:$0xff] }
 0x1d6   : > { %v3200_v50 = vadd.f32 %v3097_v41, %v2902_v55  ;;  %v2905_v63 = vadd.f32 %v4571_v61, %v2607_v12  ;;  %v3107_v60 = vpop.f32.mrf.mxu0  ;;  %3441 = vst [vmem:[%s6029_s19 + $0x68] sm:$0xff] %v3409_v54  ;;  %v3408_v32 = vmax.f32 %v3376_v13, 0.0  ;;  %v3379_v4 = vadd.f32 %v6015_v3, %v3201_v28  ;;  %v6241_v28 = vld [vmem:[#allocation28_spill] sm:$0xff]  ;;  %v6243_v54 = vld [vmem:[#allocation29_spill] sm:$0xff]  ;;  %v6252_v7 = vld [vmem:[#allocation34_spill] sm:$0xff] }
 0x1d7   : > { %v2809_v52 = vpop.f32.mrf.mxu1  ;;  %v2612_v61 = vadd.f32 %v6241_v28, %v2198_v56 }
 0x1d8   : > { %v3203_v22 = vadd.f32 %v4621_v21, %v2905_v63  ;;  %v2904_v34 = vadd.f32 %v2809_v52, %v2606_v24  ;;  %v4624_v15 = vpop.f32.mrf.mxu0  ;;  %3440 = vst [vmem:[%s6029_s19 + $0x60] sm:$0xff] %v3408_v32  ;;  %v3378_v47 = vadd.f32 %v6015_v3, %v3200_v50  ;;  %v3411_v36 = vmax.f32 %v3379_v4, 0.0  ;;  %v6242_v21 = vld [vmem:[#allocation8_spill] sm:$0xff]  ;;  %v6244_v50 = vld [vmem:[#allocation9_spill] sm:$0xff]  ;;  %v6245_v63 = vld [vmem:[#allocation31_spill] sm:$0xff] }
 0x1d9   : > { %v4574_v45 = vpop.f32.mrf.mxu1  ;;  %v2201_v13 = vadd.f32 %v6243_v54, %v6242_v21  ;;  %v2200_v2 = vadd.f32 %v6245_v63, %v6244_v50  ;;  %v2203_v52 = vadd.f32 %v6247_v0, %v6246_v58  ;;  %v6261_v50 = vld [vmem:[#allocation42_spill] sm:$0xff]  ;;  %v6262_v58 = vld [vmem:[#allocation39_spill] sm:$0xff] }
 0x1da   : > { %v3202_v35 = vadd.f32 %v3107_v60, %v2904_v34  ;;  %v2907_v14 = vadd.f32 %v4574_v45, %v2609_v23  ;;  %v3117_v11 = vpop.f32.mrf.mxu0  ;;  %v3410_v31 = vmax.f32 %v3378_v47, 0.0  ;;  %v3381_v6 = vadd.f32 %v6015_v3, %v3203_v22  ;;  %3443 = vst [vmem:[%s6029_s19 + $0x78] sm:$0xff] %v3411_v36  ;;  %v6249_v45 = vld [vmem:[#allocation32_spill] sm:$0xff]  ;;  %v6250_v47 = vld [vmem:[#allocation11_spill] sm:$0xff] }
 0x1db   : > { %v2819_v33 = vpop.f32.mrf.mxu1  ;;  %v2615_v4 = vadd.f32 %v6248_v38, %v2201_v13  ;;  %v2617_v36 = vadd.f32 %v6252_v7, %v2203_v52  ;;  %v6260_v13 = vld [vmem:[#allocation15_spill] sm:$0xff]  ;;  %v6263_v52 = vld [vmem:[#allocation41_spill] sm:$0xff] }
 0x1dc   : > { %v3205_v49 = vadd.f32 %v4624_v15, %v2907_v14  ;;  %v2906_v17 = vadd.f32 %v2819_v33, %v2608_v29  ;;  %v4627_v26 = vpop.f32.mrf.mxu0  ;;  %3442 = vst [vmem:[%s6029_s19 + $0x70] sm:$0xff] %v3410_v31  ;;  %v3413_v12 = vmax.f32 %v3381_v6, 0.0  ;;  %v3380_v51 = vadd.f32 %v6015_v3, %v3202_v35  ;;  %v6251_v35 = vld [vmem:[#allocation35_spill] sm:$0xff]  ;;  %v6253_v33 = vld [vmem:[#allocation12_spill] sm:$0xff] }
 0x1dd   : > { %v4577_v43 = vpop.f32.mrf.mxu1  ;;  %v2614_v15 = vadd.f32 %v6249_v45, %v2200_v2  ;;  %v2202_v14 = vadd.f32 %v6251_v35, %v6250_v47  ;;  %v2206_v63 = vadd.f32 %v6261_v50, %v6260_v13 }
 0x1de   : > { %v2909_v19 = vadd.f32 %v4577_v43, %v2611_v44  ;;  %v3204_v48 = vadd.f32 %v3117_v11, %v2906_v17  ;;  %v3127_v10 = vpop.f32.mrf.mxu0  ;;  %3445 = vst [vmem:[%s6029_s19 + $0x88] sm:$0xff] %v3413_v12  ;;  %v3412_v42 = vmax.f32 %v3380_v51, 0.0  ;;  %v3383_v55 = vadd.f32 %v6015_v3, %v3205_v49 }
 0x1df   : > { %v2829_v41 = vpop.f32.mrf.mxu1  ;;  %v2205_v11 = vadd.f32 %v5983_v25, %v6253_v33  ;;  %v2616_v56 = vadd.f32 %v6254_v57, %v2202_v14 }
 0x1e0   : > { %v3207_v30 = vadd.f32 %v4627_v26, %v2909_v19  ;;  %v2908_v24 = vadd.f32 %v2829_v41, %v2610_v20  ;;  %v4630_v39 = vpop.f32.mrf.mxu0  ;;  %3444 = vst [vmem:[%s6029_s19 + $0x80] sm:$0xff] %v3412_v42  ;;  %v3415_v5 = vmax.f32 %v3383_v55, 0.0  ;;  %v3382_v60 = vadd.f32 %v6015_v3, %v3204_v48  ;;  %v6256_v48 = vld [vmem:[#allocation13_spill] sm:$0xff]  ;;  %v6257_v41 = vld [vmem:[#allocation38_spill] sm:$0xff]  ;;  %v6259_v55 = vld [vmem:[#allocation40_spill] sm:$0xff] }
 0x1e1   : > { %v4580_v23 = vpop.f32.mrf.mxu1  ;;  %v6258_v42 = vld [vmem:[#allocation14_spill] sm:$0xff] }
 0x1e2   : > { %v3206_v53 = vadd.f32 %v3127_v10, %v2908_v24  ;;  %v2911_v62 = vadd.f32 %v4580_v23, %v2613_v1  ;;  %v3137_v22 = vpop.f32.mrf.mxu0  ;;  %3447 = vst [vmem:[%s6029_s19 + $0x98] sm:$0xff] %v3415_v5  ;;  %v3385_v34 = vadd.f32 %v6015_v3, %v3207_v30  ;;  %v3414_v9 = vmax.f32 %v3382_v60, 0.0 }
 0x1e3   : > { %v2839_v32 = vpop.f32.mrf.mxu1  ;;  %v2619_v1 = vadd.f32 %v6255_v8, %v2205_v11  ;;  %v2204_v10 = vadd.f32 %v6257_v41, %v6256_v48  ;;  %v2207_v30 = vadd.f32 %v6259_v55, %v6258_v42 }
 0x1e4   : > { %v3209_v16 = vadd.f32 %v4630_v39, %v2911_v62  ;;  %v2910_v59 = vadd.f32 %v2839_v32, %v2612_v61  ;;  %v4633_v18 = vpop.f32.mrf.mxu0  ;;  %v3417_v44 = vmax.f32 %v3385_v34, 0.0  ;;  %v3384_v37 = vadd.f32 %v6015_v3, %v3206_v53  ;;  %3446 = vst [vmem:[%s6029_s19 + $0x90] sm:$0xff] %v3414_v9 }
 0x1e5   : > { %v4583_v29 = vpop.f32.mrf.mxu1  ;;  %v2618_v0 = vadd.f32 %v6262_v58, %v2204_v10  ;;  %v2621_v60 = vadd.f32 %v6263_v52, %v2207_v30 }
 0x1e6   : > { %v3208_v27 = vadd.f32 %v3137_v22, %v2910_v59  ;;  %v2913_v31 = vadd.f32 %v4583_v29, %v2615_v4  ;;  %v3147_v49 = vpop.f32.mrf.mxu0  ;;  %3449 = vst [vmem:[%s6029_s19 + $0xa8] sm:$0xff] %v3417_v44  ;;  %v3416_v40 = vmax.f32 %v3384_v37, 0.0  ;;  %v3387_v20 = vadd.f32 %v6015_v3, %v3209_v16  ;;  %v6264_v4 = vld [vmem:[#allocation43_spill] sm:$0xff] }
 0x1e7   : > { %v2849_v6 = vpop.f32.mrf.mxu1  ;;  %v2620_v45 = vadd.f32 %v6264_v4, %v2206_v63 }
 0x1e8   : > { %v2912_v46 = vadd.f32 %v2849_v6, %v2614_v15  ;;  %v3211_v17 = vadd.f32 %v4633_v18, %v2913_v31  ;;  %v4636_v26 = vpop.f32.mrf.mxu0  ;;  %3448 = vst [vmem:[%s6029_s19 + $0xa0] sm:$0xff] %v3416_v40  ;;  %v3419_v12 = vmax.f32 %v3387_v20, 0.0  ;;  %v3386_v51 = vadd.f32 %v6015_v3, %v3208_v27 }
 0x1e9   : > { %v4586_v43 = vpop.f32.mrf.mxu1 }
 0x1ea   : > { %v3210_v25 = vadd.f32 %v3147_v49, %v2912_v46  ;;  %v2915_v19 = vadd.f32 %v4586_v43, %v2617_v36  ;;  %v3157_v28 = vpop.f32.mrf.mxu0  ;;  %3451 = vst [vmem:[%s6029_s19 + $0xb8] sm:$0xff] %v3419_v12  ;;  %v3418_v61 = vmax.f32 %v3386_v51, 0.0  ;;  %v3389_v2 = vadd.f32 %v6015_v3, %v3211_v17 }
 0x1eb   : > { %v2859_v24 = vpop.f32.mrf.mxu1 }
 0x1ec   : > { %v3213_v21 = vadd.f32 %v4636_v26, %v2915_v19  ;;  %v2914_v54 = vadd.f32 %v2859_v24, %v2616_v56  ;;  %v4639_v39 = vpop.f32.mrf.mxu0  ;;  %3450 = vst [vmem:[%s6029_s19 + $0xb0] sm:$0xff] %v3418_v61  ;;  %v3388_v5 = vadd.f32 %v6015_v3, %v3210_v25  ;;  %v3421_v32 = vmax.f32 %v3389_v2, 0.0 }
 0x1ed   : > { %v4589_v23 = vpop.f32.mrf.mxu1 }
 0x1ee   : > { %v3212_v53 = vadd.f32 %v3157_v28, %v2914_v54  ;;  %v2917_v62 = vadd.f32 %v4589_v23, %v2619_v1  ;;  %v3167_v34 = vpop.f32.mrf.mxu0  ;;  %v3420_v16 = vmax.f32 %v3388_v5, 0.0  ;;  %v3391_v59 = vadd.f32 %v6015_v3, %v3213_v21  ;;  %3453 = vst [vmem:[%s6029_s19 + $0xc8] sm:$0xff] %v3421_v32 }
 0x1ef   : > { %v2869_v22 = vpop.f32.mrf.mxu1 }
 0x1f0   : > { %v3215_v38 = vadd.f32 %v4639_v39, %v2917_v62  ;;  %v2916_v15 = vadd.f32 %v2869_v22, %v2618_v0  ;;  %v4642_v35 = vpop.f32.mrf.mxu0  ;;  %3452 = vst [vmem:[%s6029_s19 + $0xc0] sm:$0xff] %v3420_v16  ;;  %v3423_v14 = vmax.f32 %v3391_v59, 0.0  ;;  %v3390_v9 = vadd.f32 %v6015_v3, %v3212_v53 }
 0x1f1   : > { %v4592_v47 = vpop.f32.mrf.mxu1 }
 0x1f2   : > { %v2919_v29 = vadd.f32 %v4592_v47, %v2621_v60  ;;  %v3214_v18 = vadd.f32 %v3167_v34, %v2916_v15  ;;  %3455 = vst [vmem:[%s6029_s19 + $0xd8] sm:$0xff] %v3423_v14  ;;  %v3422_v37 = vmax.f32 %v3390_v9, 0.0  ;;  %v3393_v27 = vadd.f32 %v6015_v3, %v3215_v38  ;;  %v3177_v33 = vpop.f32.mrf.mxu0 }
 0x1f3   : > { %v2879_v44 = vpop.f32.mrf.mxu1 }
 0x1f4   : > { %v3217_v7 = vadd.f32 %v4642_v35, %v2919_v29  ;;  %v2918_v36 = vadd.f32 %v2879_v44, %v2620_v45  ;;  %3454 = vst [vmem:[%s6029_s19 + $0xd0] sm:$0xff] %v3422_v37  ;;  %v3425_v11 = vmax.f32 %v3393_v27, 0.0  ;;  %v3392_v6 = vadd.f32 %v6015_v3, %v3214_v18 }
 0x1f6   : > { %v3216_v31 = vadd.f32 %v3177_v33, %v2918_v36  ;;  %3457 = vst [vmem:[%s6029_s19 + $0xe8] sm:$0xff] %v3425_v11  ;;  %v3395_v49 = vadd.f32 %v6015_v3, %v3217_v7  ;;  %v3424_v40 = vmax.f32 %v3392_v6, 0.0 }
 0x1f8   : > { %v3427_v20 = vmax.f32 %v3395_v49, 0.0  ;;  %v3394_v46 = vadd.f32 %v6015_v3, %v3216_v31  ;;  %3456 = vst [vmem:[%s6029_s19 + $0xe0] sm:$0xff] %v3424_v40 }
 0x1fa   : > { %3459 = vst [vmem:[%s6029_s19 + $0xf8] sm:$0xff] %v3427_v20  ;;  %v3426_v57 = vmax.f32 %v3394_v46, 0.0 }
 0x1fc   : > { %3458 = vst [vmem:[%s6029_s19 + $0xf0] sm:$0xff] %v3426_v57 }
 0x1fd PF: > { %s13_s14 = sadd.s32 1, %s4693_s14   ;;  %s6265_s12 = smov %s4689_s13 }
 0x1fe   : > { %p10_p5 = scmp.ge.s32.totalorder %s13_s14, 4   ;;  %s6266_s13 = smov %s6268_s15 }
 0x200   :  { %12 = sbr.rel (!%p10_p5) target bundleno = 2 (0x2), region = 88 }

</bundles_post_ra>
